<compile_context>
chip_gen: v7x
topology: tpu7x:2x2x1
jax: 0.10.0
libtpu: 0.0.40
codegen_flags: <defaults>
</compile_context>

<pallas_src>
import functools
import numpy as np
import jax
import jax.numpy as jnp
from jax.experimental import pallas as pl
from jax.experimental.pallas import tpu as pltpu

PI = float(np.pi)

# ---- constants from postprocess.__init__ ----
DOWN_RATIO = 4
ORIEN_BIN_SIZE = 4
MAX_DETECTION = 50
DET_THRESHOLD = 0.29
DEPTH_MIN, DEPTH_MAX = 0.1, 200.0
ALPHA_CENTERS = (0.0, PI / 2.0, PI, -PI / 2.0)
DIM_MEAN = np.array(
    [[3.99331126, 1.54370861, 1.64175497],
     [0.295, 1.6, 0.3175],
     [1.34645161, 1.55322581, 0.3883871],
     [2.503, 1.72, 1.077],
     [9.1775, 2.95, 2.3425],
     [10.3655102, 3.31632653, 2.45469388],
     [6.016911083, 3.412001685, 2.2783185],
     [4.824963, 2.046904, 1.78939],
     [8.8040879, 2.916193, 2.07649252]], dtype=np.float32)
# dim_std unused because dim_modes[2] is False.

K_PAD = 128      # candidate axis padded to a full 128-lane vreg
OUT_ROWS = 32    # decoded fields (rows) per candidate


# ----------------------------------------------------------------------------
# Kernel 1: heatmap NMS (max_pool2d(k=5, s=1, p=2); keep only local maxima)
# Separable max per (batch, class) 2D slab; shifts via pltpu.roll + iota masks.
# ----------------------------------------------------------------------------
def nms_hm_pallas(heat, kernel=5):
    B, C, H, W = heat.shape
    pad = kernel // 2
    roll_w = (W % 128 == 0)   # lane rotate needs a lane-aligned extent
    roll_h = (H % 8 == 0)     # sublane rotate needs a sublane-aligned extent
    neg = float(-np.inf)

    def nms_kernel(hm_ref, out_ref):
        x = hm_ref[...]                                       # (H, W)

        # ---- 1 x k max along W (lane axis) ----
        if roll_w:
            lane = jax.lax.broadcasted_iota(jnp.int32, (H, W), 1)
            r = x
            for d in range(-pad, pad + 1):
                if d == 0:
                    continue
                shifted = pltpu.roll(x, shift=(-d) % W, axis=1)   # pos w holds x[w+d]
                valid = jnp.logical_and(lane + d >= 0, lane + d < W)
                r = jnp.maximum(r, jnp.where(valid, shifted, neg))
        else:
            negw = jnp.full((H, pad), neg, x.dtype)
            xw = jnp.concatenate([negw, x, negw], axis=1)
            r = xw[:, 0:W]
            for d in range(1, kernel):
                r = jnp.maximum(r, xw[:, d:d + W])

        # ---- k x 1 max along H (sublane axis) ----
        if roll_h:
            sub = jax.lax.broadcasted_iota(jnp.int32, (H, W), 0)
            m = r
            for d in range(-pad, pad + 1):
                if d == 0:
                    continue
                shifted = pltpu.roll(r, shift=(-d) % H, axis=0)
                valid = jnp.logical_and(sub + d >= 0, sub + d < H)
                m = jnp.maximum(m, jnp.where(valid, shifted, neg))
        else:
            negh = jnp.full((pad, W), neg, x.dtype)
            rh = jnp.concatenate([negh, r, negh], axis=0)
            m = rh[0:H, :]
            for d in range(1, kernel):
                m = jnp.maximum(m, rh[d:d + H, :])

        # keep only positions equal to the window max (same equality semantics as torch)
        out_ref[...] = jnp.where(m == x, x, 0.0)

    return pl.pallas_call(
        nms_kernel,
        out_shape=jax.ShapeDtypeStruct((B, C, H, W), heat.dtype),
        grid=(B, C),
        in_specs=[pl.BlockSpec((None, None, H, W), lambda b, c: (b, c, 0, 0))],
        out_specs=pl.BlockSpec((None, None, H, W), lambda b, c: (b, c, 0, 0)),
        compiler_params=pltpu.CompilerParams(
            dimension_semantics=("parallel", "parallel")),
    )(heat)


# ----------------------------------------------------------------------------
# Glue (inside the fused jit): top-k selection and channel-major POI gather
# ----------------------------------------------------------------------------
def select_topk(heat, K):
    B, C, H, W = heat.shape
    flat = heat.reshape(B, C, H * W)
    sc_all, ind_all = jax.lax.top_k(flat, K)                  # (B, C, K)
    sc, ind = jax.lax.top_k(sc_all.reshape(B, C * K), K)      # (B, K)
    clses = (ind // K).astype(jnp.float32)
    indexs = jnp.take_along_axis(ind_all.reshape(B, C * K), ind, axis=1)   # (B, K) int
    ys = (indexs // W).astype(jnp.float32)
    xs = (indexs % W).astype(jnp.float32)
    return sc, indexs, clses, ys, xs


def gather_regs_channel_major(index, feature_maps):
    # feature_maps (B, C, H, W); index (B, Kp) -> (B, C, Kp); no transpose of the big map.
    B, C, H, W = feature_maps.shape
    fm = feature_maps.reshape(B, C, H * W)
    idx = jnp.broadcast_to(index[:, None, :].astype(jnp.int32), (B, C, index.shape[1]))
    return jnp.take_along_axis(fm, idx, axis=2)


# ----------------------------------------------------------------------------
# Kernel 2: per-candidate decode, transposed layout (fields = rows, candidates = lanes)
# regs_full rows: 0..C_reg-1 regression channels, C_reg: xs, C_reg+1: ys, C_reg+2: cls
# output rows:
#   0:4  box2d | 4:7 dims(h,w,l) | 7 depth | 8:11 location(x, y+h/2, z)
#   11 ori_off0 | 12 ori_off1 | 13 alpha_center | 14:22 keypoints(x,y)*4
#   22:26 kpt_visible(0/1) | 26 center_type | 27:29 bbox_point*4 | 29:32 pad
# ----------------------------------------------------------------------------
def decode_pallas(regs_full, calib_vec, *, c_reg, input_width, input_height):
    assert c_reg >= 47, "decode reads regression channels [0, 47)"
    n_rows, kpad = regs_full.shape
    wlim = float(input_width)
    hlim = float(input_height)
    dm = DIM_MEAN

    def decode_kernel(regs_ref, calib_ref, out_ref):
        def row(i):                                   # one (1, kpad) lane-dense vreg row
            return regs_ref[i:i + 1, :]

        x = row(c_reg)            # xs
        y = row(c_reg + 1)        # ys
        cls = row(c_reg + 2)      # class id (float)

        f_u = calib_ref[0]; f_v = calib_ref[1]
        c_u = calib_ref[2]; c_v = calib_ref[3]
        b_x = calib_ref[4]; b_y = calib_ref[5]

        # ---- decode_box2d_fcos (centers include the 3D offset) ----
        cx = x + row(4)
        cy = y + row(5)
        x0 = jnp.clip((cx - jnp.maximum(row(0), 0.0)) * 4.0, 0.0, wlim)
        y0 = jnp.clip((cy - jnp.maximum(row(1), 0.0)) * 4.0, 0.0, hlim)
        x1 = jnp.clip((cx + jnp.maximum(row(2), 0.0)) * 4.0, 0.0, wlim)
        y1 = jnp.clip((cy + jnp.maximum(row(3), 0.0)) * 4.0, 0.0, hlim)

        # ---- decode_dimension ('exp' mode); per-class mean via in-kernel constant selects ----
        mean_l = jnp.full_like(x, float(dm[0, 0]))
        mean_h = jnp.full_like(x, float(dm[0, 1]))
        mean_w = jnp.full_like(x, float(dm[0, 2]))
        for c in range(1, dm.shape[0]):
            is_c = cls == float(c)
            mean_l = jnp.where(is_c, float(dm[c, 0]), mean_l)
            mean_h = jnp.where(is_c, float(dm[c, 1]), mean_h)
            mean_w = jnp.where(is_c, float(dm[c, 2]), mean_w)
        dim_l = jnp.exp(row(22)) * mean_l
        dim_h = jnp.exp(row(23)) * mean_h
        dim_w = jnp.exp(row(24)) * mean_w

        # ---- decode_depth: 1/sigmoid(x) - 1 == exp(-x), then clamp ----
        depth = jnp.clip(jnp.exp(-row(41)), DEPTH_MIN, DEPTH_MAX)

        # ---- decode_location_flatten: project_image_to_rect (y += h/2 applied) ----
        u = cx * 4.0
        v = cy * 4.0
        loc_x = (u - c_u) * depth / f_u + b_x
        loc_y = (v - c_v) * depth / f_v + b_y + dim_h * 0.5
        # loc_z == depth

        # ---- multibin orientation: argmax(softmax(pair)[1]) == argmax(b - a) ----
        best_i = jnp.zeros_like(x)
        best_v = row(26) - row(25)
        for i in range(1, ORIEN_BIN_SIZE):
            d = row(26 + 2 * i) - row(25 + 2 * i)
            better = d > best_v
            best_i = jnp.where(better, float(i), best_i)
            best_v = jnp.where(better, d, best_v)
        sel0 = row(33)
        sel1 = row(34)
        selc = jnp.full_like(x, float(ALPHA_CENTERS[0]))
        for i in range(1, ORIEN_BIN_SIZE):
            is_i = best_i == float(i)
            sel0 = jnp.where(is_i, row(33 + 2 * i), sel0)
            sel1 = jnp.where(is_i, row(34 + 2 * i), sel1)
            selc = jnp.where(is_i, float(ALPHA_CENTERS[i]), selc)

        # ---- keypoints (rows 6..13), visibility (rows 14..21: a<b <=> softmax argmax) ----
        kpt = [(row(6 + j) + (x if j % 2 == 0 else y)) * 4.0 for j in range(8)]
        vis = [(row(14 + 2 * j) < row(15 + 2 * j)).astype(jnp.float32) for j in range(4)]

        # ---- center type: argmax on raw logits (softmax is monotonic) ----
        ct_i = jnp.zeros_like(x)
        ct_v = row(42)
        for i in range(1, 5):
            cand = row(42 + i)
            better = cand > ct_v
            ct_i = jnp.where(better, float(i), ct_i)
            ct_v = jnp.where(better, cand, ct_v)

        zero = jnp.zeros_like(x)

        # ---- epilogue: four aligned (8, kpad) row-group stores (unmasked, lane-dense) ----
        out_ref[0:8, :] = jnp.concatenate(
            [x0, y0, x1, y1, dim_h, dim_w, dim_l, depth], axis=0)
        out_ref[8:16, :] = jnp.concatenate(
            [loc_x, loc_y, depth, sel0, sel1, selc, kpt[0], kpt[1]], axis=0)
        out_ref[16:24, :] = jnp.concatenate(
            [kpt[2], kpt[3], kpt[4], kpt[5], kpt[6], kpt[7], vis[0], vis[1]], axis=0)
        out_ref[24:32, :] = jnp.concatenate(
            [vis[2], vis[3], ct_i, x * 4.0, y * 4.0, zero, zero, zero], axis=0)

    return pl.pallas_call(
        decode_kernel,
        out_shape=jax.ShapeDtypeStruct((OUT_ROWS, kpad), jnp.float32),
        in_specs=[
            pl.BlockSpec(memory_space=pltpu.MemorySpace.VMEM),   # regs_full (C_reg+3, K_PAD)
            pl.BlockSpec(memory_space=pltpu.MemorySpace.SMEM),   # calib (8,)
        ],
        out_specs=pl.BlockSpec(memory_space=pltpu.MemorySpace.VMEM),
    )(regs_full, calib_vec)


# ----------------------------------------------------------------------------
# Fused device pipeline (single jit -> single dispatch chain, one D2H at the end)
# ----------------------------------------------------------------------------
@functools.partial(jax.jit, static_argnames=("input_width", "input_height"))
def device_pipeline(output_cls, output_regs, calib_vec, *, input_width, input_height):
    c_reg = output_regs.shape[1]
    heatmap = nms_hm_pallas(output_cls, kernel=5)

    scores, indexs, clses, ys, xs = select_topk(heatmap, K=MAX_DETECTION)   # (B, K)

    # pad the candidate axis to a full 128-lane vreg (pad lanes gather flat index 0; ignored later)
    padk = ((0, 0), (0, K_PAD - MAX_DETECTION))
    indexs_p = jnp.pad(indexs, padk)
    xs_p = jnp.pad(xs, padk)
    ys_p = jnp.pad(ys, padk)
    cls_p = jnp.pad(clses, padk)

    regs_ck = gather_regs_channel_major(indexs_p, output_regs)[0]     # (C_reg, K_PAD), B==1
    aux = jnp.concatenate([xs_p, ys_p, cls_p], axis=0)                # (3, K_PAD)
    regs_full = jnp.concatenate([regs_ck, aux], axis=0)               # (C_reg+3, K_PAD)

    decoded = decode_pallas(regs_full, calib_vec, c_reg=c_reg,
                            input_width=input_width, input_height=input_height)

    # arctan + angle wrapping stay in XLA (no guaranteed Mosaic atan lowering) but inside
    # the same jit -> no extra dispatch / host round-trip.
    # TODO(synk): reference uses torch.atan (no quadrant handling / atan2); mirrored here.
    alphas = jnp.arctan(decoded[11] / decoded[12]) + decoded[13]
    rays = jnp.arctan(decoded[8] / decoded[10])
    rotys = alphas + rays
    rotys = jnp.where(rotys > PI, rotys - 2 * PI, rotys)
    rotys = jnp.where(rotys < -PI, rotys + 2 * PI, rotys)
    alphas = jnp.where(alphas > PI, alphas - 2 * PI, alphas)
    alphas = jnp.where(alphas < -PI, alphas + 2 * PI, alphas)

    return (scores.reshape(-1), indexs.reshape(-1), clses.reshape(-1),
            decoded, alphas, rotys)


# ----------------------------------------------------------------------------
# Full forward (mirrors postprocess.forward); dynamic-shape filtering on host.
# TODO(synk): torch Calibration object replaced by a flat [f_u,f_v,c_u,c_v,b_x,b_y,..] vector.
# ----------------------------------------------------------------------------
def run_postprocess(output_cls, output_regs, calib_vec, input_width, input_height):
    assert output_cls.shape[0] == 1, "forward semantics assume batch_size == 1"

    dev_out = device_pipeline(output_cls, output_regs, calib_vec,
                              input_width=input_width, input_height=input_height)
    dev_out = jax.block_until_ready(dev_out)
    # single D2H transfer of all (tiny) per-candidate results
    scores_np, indexs_np, clses_np, dec_t, alphas, rotys = jax.device_get(dev_out)

    K = MAX_DETECTION
    dec = dec_t[:, :K].T            # back to (K, 32) per-candidate rows (tiny numpy transpose)
    alphas = alphas[:K]
    rotys = rotys[:K]

    # ---- data-dependent filtering (dynamic shapes -> host side) ----
    valid = scores_np >= DET_THRESHOLD
    if valid.sum() == 0:
        return (None,) * 11
    vidx = np.nonzero(valid)[0]

    # del_dul_id: reference passes `clses` as the score -> per duplicate flat index keep the
    # entry with the largest class value (mirrors torch.topk(clses[grp], 1) semantics).
    sub_cls, sub_idx = clses_np[vidx], indexs_np[vidx]
    keep_local = []
    for gt in np.unique(sub_idx):
        grp = np.nonzero(sub_idx == gt)[0]
        keep_local.append(int(grp[np.argmax(sub_cls[grp])]))
    keep = vidx[np.array(keep_local, dtype=np.int64)]

    d = dec[keep]
    out_clses = clses_np[keep].reshape(-1, 1)
    out_alphas = alphas[keep].reshape(-1, 1)
    out_rotys = rotys[keep].reshape(-1, 1)
    out_box2d = d[:, 0:4]
    out_dims = d[:, 4:7]
    out_scores = scores_np[keep].reshape(-1, 1)
    out_locs = d[:, 8:11]
    out_kpts = d[:, 14:22].reshape(-1, 4, 2)
    out_kpt_vis = d[:, 22:26].astype(bool)
    out_bbox_pts = d[:, 27:29]
    out_center_type = d[:, 26].astype(np.int64)
    return (out_clses, out_alphas, out_rotys, out_box2d, out_dims, out_scores,
            out_locs, out_kpts, out_kpt_vis, out_bbox_pts, out_center_type)


if __name__ == "__main__":
    # small shapes: feature map 16x128 (lane-aligned W) -> input image 512x64 (down_ratio 4)
    B, C_CLS, H, W = 1, 3, 16, 128
    C_REG = 48                       # forward reads regression channels [0, 47)
    input_width, input_height = W * DOWN_RATIO, H * DOWN_RATIO

    key = jax.random.PRNGKey(0)
    k1, k2 = jax.random.split(key)
    output_cls = jax.random.uniform(k1, (B, C_CLS, H, W), jnp.float32)
    output_regs = jax.random.normal(k2, (B, C_REG, H, W), jnp.float32) * 0.5

    # calib (project_image_to_rect): [f_u, f_v, c_u, c_v, b_x, b_y, 0, 0]
    calib_vec = jnp.array([350.0, 350.0, input_width / 2.0, input_height / 2.0,
                           0.1, 0.05, 0.0, 0.0], jnp.float32)

    results = run_postprocess(output_cls, output_regs, calib_vec,
                              input_width, input_height)
    # sanity: shapes consistent when detections exist
    if results[0] is not None:
        n = results[0].shape[0]
        assert results[3].shape == (n, 4)
        assert results[4].shape == (n, 3)
        assert results[6].shape == (n, 3)
        assert results[7].shape == (n, 4, 2)
        assert results[8].shape == (n, 4)
        assert results[9].shape == (n, 2)
    print("KERNEL_OK")
</pallas_src>

<mosaic_0001>
module attributes {stable_mosaic.version = 11 : i64} {
  func.func private @main(%arg0: i32) attributes {dimension_semantics = [#tpu.dimension_semantics<core_parallel>], iteration_bounds = array<i64: 2>, tpu.core_type = #tpu.core_type<sc_scalar_subcore>, window_params = []} {
    return
  }
}

module attributes {stable_mosaic.version = 11 : i64} {
  func.func private @main(%arg0: i32) attributes {dimension_semantics = [#tpu.dimension_semantics<core_parallel>], iteration_bounds = array<i64: 2>, tpu.core_type = #tpu.core_type<sc_scalar_subcore>, window_params = []} {
    return
  }
}

module attributes {stable_mosaic.version = 11 : i64} {
  func.func @nms_kernel(%arg0: i32, %arg1: i32, %arg2: memref<1x1x16x128xf32, #tpu.memory_space<vmem>>, %arg3: memref<1x1x16x128xf32, #tpu.memory_space<vmem>>) attributes {dimension_semantics = [#tpu.dimension_semantics<parallel>, #tpu.dimension_semantics<parallel>], iteration_bounds = array<i64: 1, 3>, scalar_prefetch = 0 : i64, scratch_operands = 0 : i64, tpu.core_type = #tpu.core_type<tc>, window_params = [{transform_indices = @transform_0, window_bounds = array<i64: 1, 1, 16, 128>}, {transform_indices = @transform_1, window_bounds = array<i64: 1, 1, 16, 128>}]} {
    %c0 = arith.constant 0 : index
    %c0_0 = arith.constant 0 : index
    %c0_1 = arith.constant 0 : index
    %c0_2 = arith.constant 0 : index
    %0 = vector.load %arg2[%c0, %c0_0, %c0_1, %c0_2] : memref<1x1x16x128xf32, #tpu.memory_space<vmem>>, vector<1x1x16x128xf32>
    %1 = vector.shape_cast %0 : vector<1x1x16x128xf32> to vector<16x128xf32>
    %2 = tpu.iota {dimensions = array<i32: 1>} : vector<16x128xi32>
    %c2_i32 = arith.constant 2 : i32
    %3 = tpu.dynamic_rotate %1 by %c2_i32 dim 1 : vector<16x128xf32>, i32 -> vector<16x128xf32>
    %c-2_i32 = arith.constant -2 : i32
    %4 = vector.broadcast %c-2_i32 : i32 to vector<16x128xi32>
    %5 = arith.addi %2, %4 : vector<16x128xi32>
    %c0_i32 = arith.constant 0 : i32
    %6 = vector.broadcast %c0_i32 : i32 to vector<16x128xi32>
    %7 = arith.cmpi sge, %5, %6 : vector<16x128xi32>
    %c-2_i32_3 = arith.constant -2 : i32
    %8 = vector.broadcast %c-2_i32_3 : i32 to vector<16x128xi32>
    %9 = arith.addi %2, %8 : vector<16x128xi32>
    %c128_i32 = arith.constant 128 : i32
    %10 = vector.broadcast %c128_i32 : i32 to vector<16x128xi32>
    %11 = arith.cmpi slt, %9, %10 : vector<16x128xi32>
    %12 = arith.andi %7, %11 : vector<16x128xi1>
    %cst = arith.constant 0xFF800000 : f32
    %13 = vector.broadcast %cst : f32 to vector<16x128xf32>
    %14 = arith.select %12, %3, %13 : vector<16x128xi1>, vector<16x128xf32>
    %15 = arith.maximumf %1, %14 : vector<16x128xf32>
    %c1_i32 = arith.constant 1 : i32
    %16 = tpu.dynamic_rotate %1 by %c1_i32 dim 1 : vector<16x128xf32>, i32 -> vector<16x128xf32>
    %c-1_i32 = arith.constant -1 : i32
    %17 = vector.broadcast %c-1_i32 : i32 to vector<16x128xi32>
    %18 = arith.addi %2, %17 : vector<16x128xi32>
    %c0_i32_4 = arith.constant 0 : i32
    %19 = vector.broadcast %c0_i32_4 : i32 to vector<16x128xi32>
    %20 = arith.cmpi sge, %18, %19 : vector<16x128xi32>
    %c-1_i32_5 = arith.constant -1 : i32
    %21 = vector.broadcast %c-1_i32_5 : i32 to vector<16x128xi32>
    %22 = arith.addi %2, %21 : vector<16x128xi32>
    %c128_i32_6 = arith.constant 128 : i32
    %23 = vector.broadcast %c128_i32_6 : i32 to vector<16x128xi32>
    %24 = arith.cmpi slt, %22, %23 : vector<16x128xi32>
    %25 = arith.andi %20, %24 : vector<16x128xi1>
    %cst_7 = arith.constant 0xFF800000 : f32
    %26 = vector.broadcast %cst_7 : f32 to vector<16x128xf32>
    %27 = arith.select %25, %16, %26 : vector<16x128xi1>, vector<16x128xf32>
    %28 = arith.maximumf %15, %27 : vector<16x128xf32>
    %c127_i32 = arith.constant 127 : i32
    %29 = tpu.dynamic_rotate %1 by %c127_i32 dim 1 : vector<16x128xf32>, i32 -> vector<16x128xf32>
    %c1_i32_8 = arith.constant 1 : i32
    %30 = vector.broadcast %c1_i32_8 : i32 to vector<16x128xi32>
    %31 = arith.addi %2, %30 : vector<16x128xi32>
    %c0_i32_9 = arith.constant 0 : i32
    %32 = vector.broadcast %c0_i32_9 : i32 to vector<16x128xi32>
    %33 = arith.cmpi sge, %31, %32 : vector<16x128xi32>
    %c1_i32_10 = arith.constant 1 : i32
    %34 = vector.broadcast %c1_i32_10 : i32 to vector<16x128xi32>
    %35 = arith.addi %2, %34 : vector<16x128xi32>
    %c128_i32_11 = arith.constant 128 : i32
    %36 = vector.broadcast %c128_i32_11 : i32 to vector<16x128xi32>
    %37 = arith.cmpi slt, %35, %36 : vector<16x128xi32>
    %38 = arith.andi %33, %37 : vector<16x128xi1>
    %cst_12 = arith.constant 0xFF800000 : f32
    %39 = vector.broadcast %cst_12 : f32 to vector<16x128xf32>
    %40 = arith.select %38, %29, %39 : vector<16x128xi1>, vector<16x128xf32>
    %41 = arith.maximumf %28, %40 : vector<16x128xf32>
    %c126_i32 = arith.constant 126 : i32
    %42 = tpu.dynamic_rotate %1 by %c126_i32 dim 1 : vector<16x128xf32>, i32 -> vector<16x128xf32>
    %c2_i32_13 = arith.constant 2 : i32
    %43 = vector.broadcast %c2_i32_13 : i32 to vector<16x128xi32>
    %44 = arith.addi %2, %43 : vector<16x128xi32>
    %c0_i32_14 = arith.constant 0 : i32
    %45 = vector.broadcast %c0_i32_14 : i32 to vector<16x128xi32>
    %46 = arith.cmpi sge, %44, %45 : vector<16x128xi32>
    %c2_i32_15 = arith.constant 2 : i32
    %47 = vector.broadcast %c2_i32_15 : i32 to vector<16x128xi32>
    %48 = arith.addi %2, %47 : vector<16x128xi32>
    %c128_i32_16 = arith.constant 128 : i32
    %49 = vector.broadcast %c128_i32_16 : i32 to vector<16x128xi32>
    %50 = arith.cmpi slt, %48, %49 : vector<16x128xi32>
    %51 = arith.andi %46, %50 : vector<16x128xi1>
    %cst_17 = arith.constant 0xFF800000 : f32
    %52 = vector.broadcast %cst_17 : f32 to vector<16x128xf32>
    %53 = arith.select %51, %42, %52 : vector<16x128xi1>, vector<16x128xf32>
    %54 = arith.maximumf %41, %53 : vector<16x128xf32>
    %55 = tpu.iota {dimensions = array<i32: 0>} : vector<16x128xi32>
    %c2_i32_18 = arith.constant 2 : i32
    %56 = tpu.dynamic_rotate %54 by %c2_i32_18 dim 0 : vector<16x128xf32>, i32 -> vector<16x128xf32>
    %c-2_i32_19 = arith.constant -2 : i32
    %57 = vector.broadcast %c-2_i32_19 : i32 to vector<16x128xi32>
    %58 = arith.addi %55, %57 : vector<16x128xi32>
    %c0_i32_20 = arith.constant 0 : i32
    %59 = vector.broadcast %c0_i32_20 : i32 to vector<16x128xi32>
    %60 = arith.cmpi sge, %58, %59 : vector<16x128xi32>
    %c-2_i32_21 = arith.constant -2 : i32
    %61 = vector.broadcast %c-2_i32_21 : i32 to vector<16x128xi32>
    %62 = arith.addi %55, %61 : vector<16x128xi32>
    %c16_i32 = arith.constant 16 : i32
    %63 = vector.broadcast %c16_i32 : i32 to vector<16x128xi32>
    %64 = arith.cmpi slt, %62, %63 : vector<16x128xi32>
    %65 = arith.andi %60, %64 : vector<16x128xi1>
    %cst_22 = arith.constant 0xFF800000 : f32
    %66 = vector.broadcast %cst_22 : f32 to vector<16x128xf32>
    %67 = arith.select %65, %56, %66 : vector<16x128xi1>, vector<16x128xf32>
    %68 = arith.maximumf %54, %67 : vector<16x128xf32>
    %c1_i32_23 = arith.constant 1 : i32
    %69 = tpu.dynamic_rotate %54 by %c1_i32_23 dim 0 : vector<16x128xf32>, i32 -> vector<16x128xf32>
    %c-1_i32_24 = arith.constant -1 : i32
    %70 = vector.broadcast %c-1_i32_24 : i32 to vector<16x128xi32>
    %71 = arith.addi %55, %70 : vector<16x128xi32>
    %c0_i32_25 = arith.constant 0 : i32
    %72 = vector.broadcast %c0_i32_25 : i32 to vector<16x128xi32>
    %73 = arith.cmpi sge, %71, %72 : vector<16x128xi32>
    %c-1_i32_26 = arith.constant -1 : i32
    %74 = vector.broadcast %c-1_i32_26 : i32 to vector<16x128xi32>
    %75 = arith.addi %55, %74 : vector<16x128xi32>
    %c16_i32_27 = arith.constant 16 : i32
    %76 = vector.broadcast %c16_i32_27 : i32 to vector<16x128xi32>
    %77 = arith.cmpi slt, %75, %76 : vector<16x128xi32>
    %78 = arith.andi %73, %77 : vector<16x128xi1>
    %cst_28 = arith.constant 0xFF800000 : f32
    %79 = vector.broadcast %cst_28 : f32 to vector<16x128xf32>
    %80 = arith.select %78, %69, %79 : vector<16x128xi1>, vector<16x128xf32>
    %81 = arith.maximumf %68, %80 : vector<16x128xf32>
    %c15_i32 = arith.constant 15 : i32
    %82 = tpu.dynamic_rotate %54 by %c15_i32 dim 0 : vector<16x128xf32>, i32 -> vector<16x128xf32>
    %c1_i32_29 = arith.constant 1 : i32
    %83 = vector.broadcast %c1_i32_29 : i32 to vector<16x128xi32>
    %84 = arith.addi %55, %83 : vector<16x128xi32>
    %c0_i32_30 = arith.constant 0 : i32
    %85 = vector.broadcast %c0_i32_30 : i32 to vector<16x128xi32>
    %86 = arith.cmpi sge, %84, %85 : vector<16x128xi32>
    %c1_i32_31 = arith.constant 1 : i32
    %87 = vector.broadcast %c1_i32_31 : i32 to vector<16x128xi32>
    %88 = arith.addi %55, %87 : vector<16x128xi32>
    %c16_i32_32 = arith.constant 16 : i32
    %89 = vector.broadcast %c16_i32_32 : i32 to vector<16x128xi32>
    %90 = arith.cmpi slt, %88, %89 : vector<16x128xi32>
    %91 = arith.andi %86, %90 : vector<16x128xi1>
    %cst_33 = arith.constant 0xFF800000 : f32
    %92 = vector.broadcast %cst_33 : f32 to vector<16x128xf32>
    %93 = arith.select %91, %82, %92 : vector<16x128xi1>, vector<16x128xf32>
    %94 = arith.maximumf %81, %93 : vector<16x128xf32>
    %c14_i32 = arith.constant 14 : i32
    %95 = tpu.dynamic_rotate %54 by %c14_i32 dim 0 : vector<16x128xf32>, i32 -> vector<16x128xf32>
    %c2_i32_34 = arith.constant 2 : i32
    %96 = vector.broadcast %c2_i32_34 : i32 to vector<16x128xi32>
    %97 = arith.addi %55, %96 : vector<16x128xi32>
    %c0_i32_35 = arith.constant 0 : i32
    %98 = vector.broadcast %c0_i32_35 : i32 to vector<16x128xi32>
    %99 = arith.cmpi sge, %97, %98 : vector<16x128xi32>
    %c2_i32_36 = arith.constant 2 : i32
    %100 = vector.broadcast %c2_i32_36 : i32 to vector<16x128xi32>
    %101 = arith.addi %55, %100 : vector<16x128xi32>
    %c16_i32_37 = arith.constant 16 : i32
    %102 = vector.broadcast %c16_i32_37 : i32 to vector<16x128xi32>
    %103 = arith.cmpi slt, %101, %102 : vector<16x128xi32>
    %104 = arith.andi %99, %103 : vector<16x128xi1>
    %cst_38 = arith.constant 0xFF800000 : f32
    %105 = vector.broadcast %cst_38 : f32 to vector<16x128xf32>
    %106 = arith.select %104, %95, %105 : vector<16x128xi1>, vector<16x128xf32>
    %107 = arith.maximumf %94, %106 : vector<16x128xf32>
    %108 = arith.cmpf oeq, %107, %1 : vector<16x128xf32>
    %cst_39 = arith.constant 0.000000e+00 : f32
    %109 = vector.broadcast %cst_39 : f32 to vector<16x128xf32>
    %110 = arith.select %108, %1, %109 : vector<16x128xi1>, vector<16x128xf32>
    %c0_40 = arith.constant 0 : index
    %c0_41 = arith.constant 0 : index
    %c0_42 = arith.constant 0 : index
    %c0_43 = arith.constant 0 : index
    %111 = vector.load %arg3[%c0_40, %c0_41, %c0_42, %c0_43] : memref<1x1x16x128xf32, #tpu.memory_space<vmem>>, vector<1x1x16x128xf32>
    %112 = vector.shape_cast %111 : vector<1x1x16x128xf32> to vector<16x128xf32>
    %113 = vector.shape_cast %110 : vector<16x128xf32> to vector<1x1x16x128xf32>
    tpu.vector_store %arg3[%c0_40, %c0_41, %c0_42, %c0_43], %113 {strides = array<i32>} : memref<1x1x16x128xf32, #tpu.memory_space<vmem>>, vector<1x1x16x128xf32>,
    return
  }
  func.func @transform_0(%arg0: i32, %arg1: i32) -> (i32, i32, i32, i32) {
    %c0_i32 = arith.constant 0 : i32
    %c0_i32_0 = arith.constant 0 : i32
    %c0_i32_1 = arith.constant 0 : i32
    return %arg0, %arg1, %c0_i32, %c0_i32_0 : i32, i32, i32, i32
  }
  func.func @transform_1(%arg0: i32, %arg1: i32) -> (i32, i32, i32, i32) {
    %c0_i32 = arith.constant 0 : i32
    %c0_i32_0 = arith.constant 0 : i32
    %c0_i32_1 = arith.constant 0 : i32
    return %arg0, %arg1, %c0_i32, %c0_i32_0 : i32, i32, i32, i32
  }
}

module attributes {stable_mosaic.version = 11 : i64} {
  func.func @decode_kernel(%arg0: memref<51x128xf32, #tpu.memory_space<vmem>>, %arg1: memref<8xf32, #tpu.memory_space<smem>>, %arg2: memref<32x128xf32, #tpu.memory_space<vmem>>) attributes {dimension_semantics = [], scalar_prefetch = 0 : i64, scratch_operands = 0 : i64, tpu.core_type = #tpu.core_type<tc>} {
    %c48 = arith.constant 48 : index
    %c0 = arith.constant 0 : index
    %0 = vector.load %arg0[%c48, %c0] : memref<51x128xf32, #tpu.memory_space<vmem>>, vector<1x128xf32>
    %c49 = arith.constant 49 : index
    %c0_0 = arith.constant 0 : index
    %1 = vector.load %arg0[%c49, %c0_0] : memref<51x128xf32, #tpu.memory_space<vmem>>, vector<1x128xf32>
    %c50 = arith.constant 50 : index
    %c0_1 = arith.constant 0 : index
    %2 = vector.load %arg0[%c50, %c0_1] : memref<51x128xf32, #tpu.memory_space<vmem>>, vector<1x128xf32>
    %c0_2 = arith.constant 0 : index
    %3 = memref.load %arg1[%c0_2] : memref<8xf32, #tpu.memory_space<smem>>
    %c1 = arith.constant 1 : index
    %4 = memref.load %arg1[%c1] : memref<8xf32, #tpu.memory_space<smem>>
    %c2 = arith.constant 2 : index
    %5 = memref.load %arg1[%c2] : memref<8xf32, #tpu.memory_space<smem>>
    %c3 = arith.constant 3 : index
    %6 = memref.load %arg1[%c3] : memref<8xf32, #tpu.memory_space<smem>>
    %c4 = arith.constant 4 : index
    %7 = memref.load %arg1[%c4] : memref<8xf32, #tpu.memory_space<smem>>
    %c5 = arith.constant 5 : index
    %8 = memref.load %arg1[%c5] : memref<8xf32, #tpu.memory_space<smem>>
    %c4_3 = arith.constant 4 : index
    %c0_4 = arith.constant 0 : index
    %9 = vector.load %arg0[%c4_3, %c0_4] : memref<51x128xf32, #tpu.memory_space<vmem>>, vector<1x128xf32>
    %10 = arith.addf %0, %9 : vector<1x128xf32>
    %c5_5 = arith.constant 5 : index
    %c0_6 = arith.constant 0 : index
    %11 = vector.load %arg0[%c5_5, %c0_6] : memref<51x128xf32, #tpu.memory_space<vmem>>, vector<1x128xf32>
    %12 = arith.addf %1, %11 : vector<1x128xf32>
    %c0_7 = arith.constant 0 : index
    %c0_8 = arith.constant 0 : index
    %13 = vector.load %arg0[%c0_7, %c0_8] : memref<51x128xf32, #tpu.memory_space<vmem>>, vector<1x128xf32>
    %cst = arith.constant 0.000000e+00 : f32
    %14 = vector.broadcast %cst : f32 to vector<1x128xf32>
    %15 = arith.maximumf %13, %14 : vector<1x128xf32>
    %16 = arith.subf %10, %15 : vector<1x128xf32>
    %cst_9 = arith.constant 4.000000e+00 : f32
    %17 = vector.broadcast %cst_9 : f32 to vector<1x128xf32>
    %18 = arith.mulf %16, %17 : vector<1x128xf32>
    %cst_10 = arith.constant 0.000000e+00 : f32
    %cst_11 = arith.constant 5.120000e+02 : f32
    %19 = vector.broadcast %cst_10 : f32 to vector<1x128xf32>
    %20 = arith.maximumf %19, %18 : vector<1x128xf32>
    %21 = vector.broadcast %cst_11 : f32 to vector<1x128xf32>
    %22 = arith.minimumf %21, %20 : vector<1x128xf32>
    %c1_12 = arith.constant 1 : index
    %c0_13 = arith.constant 0 : index
    %23 = vector.load %arg0[%c1_12, %c0_13] : memref<51x128xf32, #tpu.memory_space<vmem>>, vector<1x128xf32>
    %cst_14 = arith.constant 0.000000e+00 : f32
    %24 = vector.broadcast %cst_14 : f32 to vector<1x128xf32>
    %25 = arith.maximumf %23, %24 : vector<1x128xf32>
    %26 = arith.subf %12, %25 : vector<1x128xf32>
    %cst_15 = arith.constant 4.000000e+00 : f32
    %27 = vector.broadcast %cst_15 : f32 to vector<1x128xf32>
    %28 = arith.mulf %26, %27 : vector<1x128xf32>
    %cst_16 = arith.constant 0.000000e+00 : f32
    %cst_17 = arith.constant 6.400000e+01 : f32
    %29 = vector.broadcast %cst_16 : f32 to vector<1x128xf32>
    %30 = arith.maximumf %29, %28 : vector<1x128xf32>
    %31 = vector.broadcast %cst_17 : f32 to vector<1x128xf32>
    %32 = arith.minimumf %31, %30 : vector<1x128xf32>
    %c2_18 = arith.constant 2 : index
    %c0_19 = arith.constant 0 : index
    %33 = vector.load %arg0[%c2_18, %c0_19] : memref<51x128xf32, #tpu.memory_space<vmem>>, vector<1x128xf32>
    %cst_20 = arith.constant 0.000000e+00 : f32
    %34 = vector.broadcast %cst_20 : f32 to vector<1x128xf32>
    %35 = arith.maximumf %33, %34 : vector<1x128xf32>
    %36 = arith.addf %10, %35 : vector<1x128xf32>
    %cst_21 = arith.constant 4.000000e+00 : f32
    %37 = vector.broadcast %cst_21 : f32 to vector<1x128xf32>
    %38 = arith.mulf %36, %37 : vector<1x128xf32>
    %cst_22 = arith.constant 0.000000e+00 : f32
    %cst_23 = arith.constant 5.120000e+02 : f32
    %39 = vector.broadcast %cst_22 : f32 to vector<1x128xf32>
    %40 = arith.maximumf %39, %38 : vector<1x128xf32>
    %41 = vector.broadcast %cst_23 : f32 to vector<1x128xf32>
    %42 = arith.minimumf %41, %40 : vector<1x128xf32>
    %c3_24 = arith.constant 3 : index
    %c0_25 = arith.constant 0 : index
    %43 = vector.load %arg0[%c3_24, %c0_25] : memref<51x128xf32, #tpu.memory_space<vmem>>, vector<1x128xf32>
    %cst_26 = arith.constant 0.000000e+00 : f32
    %44 = vector.broadcast %cst_26 : f32 to vector<1x128xf32>
    %45 = arith.maximumf %43, %44 : vector<1x128xf32>
    %46 = arith.addf %12, %45 : vector<1x128xf32>
    %cst_27 = arith.constant 4.000000e+00 : f32
    %47 = vector.broadcast %cst_27 : f32 to vector<1x128xf32>
    %48 = arith.mulf %46, %47 : vector<1x128xf32>
    %cst_28 = arith.constant 0.000000e+00 : f32
    %cst_29 = arith.constant 6.400000e+01 : f32
    %49 = vector.broadcast %cst_28 : f32 to vector<1x128xf32>
    %50 = arith.maximumf %49, %48 : vector<1x128xf32>
    %51 = vector.broadcast %cst_29 : f32 to vector<1x128xf32>
    %52 = arith.minimumf %51, %50 : vector<1x128xf32>
    %cst_30 = arith.constant 3.99331117 : f32
    %53 = vector.broadcast %cst_30 : f32 to vector<1x128xf32>
    %cst_31 = arith.constant 1.54370856 : f32
    %54 = vector.broadcast %cst_31 : f32 to vector<1x128xf32>
    %cst_32 = arith.constant 1.64175498 : f32
    %55 = vector.broadcast %cst_32 : f32 to vector<1x128xf32>
    %cst_33 = arith.constant 1.000000e+00 : f32
    %56 = vector.broadcast %cst_33 : f32 to vector<1x128xf32>
    %57 = arith.cmpf oeq, %2, %56 : vector<1x128xf32>
    %cst_34 = arith.constant 2.950000e-01 : f32
    %58 = vector.broadcast %cst_34 : f32 to vector<1x128xf32>
    %59 = arith.select %57, %58, %53 : vector<1x128xi1>, vector<1x128xf32>
    %cst_35 = arith.constant 1.600000e+00 : f32
    %60 = vector.broadcast %cst_35 : f32 to vector<1x128xf32>
    %61 = arith.select %57, %60, %54 : vector<1x128xi1>, vector<1x128xf32>
    %cst_36 = arith.constant 3.175000e-01 : f32
    %62 = vector.broadcast %cst_36 : f32 to vector<1x128xf32>
    %63 = arith.select %57, %62, %55 : vector<1x128xi1>, vector<1x128xf32>
    %cst_37 = arith.constant 2.000000e+00 : f32
    %64 = vector.broadcast %cst_37 : f32 to vector<1x128xf32>
    %65 = arith.cmpf oeq, %2, %64 : vector<1x128xf32>
    %cst_38 = arith.constant 1.34645164 : f32
    %66 = vector.broadcast %cst_38 : f32 to vector<1x128xf32>
    %67 = arith.select %65, %66, %59 : vector<1x128xi1>, vector<1x128xf32>
    %cst_39 = arith.constant 1.55322576 : f32
    %68 = vector.broadcast %cst_39 : f32 to vector<1x128xf32>
    %69 = arith.select %65, %68, %61 : vector<1x128xi1>, vector<1x128xf32>
    %cst_40 = arith.constant 0.388387114 : f32
    %70 = vector.broadcast %cst_40 : f32 to vector<1x128xf32>
    %71 = arith.select %65, %70, %63 : vector<1x128xi1>, vector<1x128xf32>
    %cst_41 = arith.constant 3.000000e+00 : f32
    %72 = vector.broadcast %cst_41 : f32 to vector<1x128xf32>
    %73 = arith.cmpf oeq, %2, %72 : vector<1x128xf32>
    %cst_42 = arith.constant 2.503000e+00 : f32
    %74 = vector.broadcast %cst_42 : f32 to vector<1x128xf32>
    %75 = arith.select %73, %74, %67 : vector<1x128xi1>, vector<1x128xf32>
    %cst_43 = arith.constant 1.720000e+00 : f32
    %76 = vector.broadcast %cst_43 : f32 to vector<1x128xf32>
    %77 = arith.select %73, %76, %69 : vector<1x128xi1>, vector<1x128xf32>
    %cst_44 = arith.constant 1.077000e+00 : f32
    %78 = vector.broadcast %cst_44 : f32 to vector<1x128xf32>
    %79 = arith.select %73, %78, %71 : vector<1x128xi1>, vector<1x128xf32>
    %cst_45 = arith.constant 4.000000e+00 : f32
    %80 = vector.broadcast %cst_45 : f32 to vector<1x128xf32>
    %81 = arith.cmpf oeq, %2, %80 : vector<1x128xf32>
    %cst_46 = arith.constant 9.17749977 : f32
    %82 = vector.broadcast %cst_46 : f32 to vector<1x128xf32>
    %83 = arith.select %81, %82, %75 : vector<1x128xi1>, vector<1x128xf32>
    %cst_47 = arith.constant 2.950000e+00 : f32
    %84 = vector.broadcast %cst_47 : f32 to vector<1x128xf32>
    %85 = arith.select %81, %84, %77 : vector<1x128xi1>, vector<1x128xf32>
    %cst_48 = arith.constant 2.342500e+00 : f32
    %86 = vector.broadcast %cst_48 : f32 to vector<1x128xf32>
    %87 = arith.select %81, %86, %79 : vector<1x128xi1>, vector<1x128xf32>
    %cst_49 = arith.constant 5.000000e+00 : f32
    %88 = vector.broadcast %cst_49 : f32 to vector<1x128xf32>
    %89 = arith.cmpf oeq, %2, %88 : vector<1x128xf32>
    %cst_50 = arith.constant 10.36551 : f32
    %90 = vector.broadcast %cst_50 : f32 to vector<1x128xf32>
    %91 = arith.select %89, %90, %83 : vector<1x128xi1>, vector<1x128xf32>
    %cst_51 = arith.constant 3.31632662 : f32
    %92 = vector.broadcast %cst_51 : f32 to vector<1x128xf32>
    %93 = arith.select %89, %92, %85 : vector<1x128xi1>, vector<1x128xf32>
    %cst_52 = arith.constant 2.45469379 : f32
    %94 = vector.broadcast %cst_52 : f32 to vector<1x128xf32>
    %95 = arith.select %89, %94, %87 : vector<1x128xi1>, vector<1x128xf32>
    %cst_53 = arith.constant 6.000000e+00 : f32
    %96 = vector.broadcast %cst_53 : f32 to vector<1x128xf32>
    %97 = arith.cmpf oeq, %2, %96 : vector<1x128xf32>
    %cst_54 = arith.constant 6.01691103 : f32
    %98 = vector.broadcast %cst_54 : f32 to vector<1x128xf32>
    %99 = arith.select %97, %98, %91 : vector<1x128xi1>, vector<1x128xf32>
    %cst_55 = arith.constant 3.41200161 : f32
    %100 = vector.broadcast %cst_55 : f32 to vector<1x128xf32>
    %101 = arith.select %97, %100, %93 : vector<1x128xi1>, vector<1x128xf32>
    %cst_56 = arith.constant 2.27831841 : f32
    %102 = vector.broadcast %cst_56 : f32 to vector<1x128xf32>
    %103 = arith.select %97, %102, %95 : vector<1x128xi1>, vector<1x128xf32>
    %cst_57 = arith.constant 7.000000e+00 : f32
    %104 = vector.broadcast %cst_57 : f32 to vector<1x128xf32>
    %105 = arith.cmpf oeq, %2, %104 : vector<1x128xf32>
    %cst_58 = arith.constant 4.82496309 : f32
    %106 = vector.broadcast %cst_58 : f32 to vector<1x128xf32>
    %107 = arith.select %105, %106, %99 : vector<1x128xi1>, vector<1x128xf32>
    %cst_59 = arith.constant 2.04690409 : f32
    %108 = vector.broadcast %cst_59 : f32 to vector<1x128xf32>
    %109 = arith.select %105, %108, %101 : vector<1x128xi1>, vector<1x128xf32>
    %cst_60 = arith.constant 1.789390e+00 : f32
    %110 = vector.broadcast %cst_60 : f32 to vector<1x128xf32>
    %111 = arith.select %105, %110, %103 : vector<1x128xi1>, vector<1x128xf32>
    %cst_61 = arith.constant 8.000000e+00 : f32
    %112 = vector.broadcast %cst_61 : f32 to vector<1x128xf32>
    %113 = arith.cmpf oeq, %2, %112 : vector<1x128xf32>
    %cst_62 = arith.constant 8.80408763 : f32
    %114 = vector.broadcast %cst_62 : f32 to vector<1x128xf32>
    %115 = arith.select %113, %114, %107 : vector<1x128xi1>, vector<1x128xf32>
    %cst_63 = arith.constant 2.91619301 : f32
    %116 = vector.broadcast %cst_63 : f32 to vector<1x128xf32>
    %117 = arith.select %113, %116, %109 : vector<1x128xi1>, vector<1x128xf32>
    %cst_64 = arith.constant 2.07649255 : f32
    %118 = vector.broadcast %cst_64 : f32 to vector<1x128xf32>
    %119 = arith.select %113, %118, %111 : vector<1x128xi1>, vector<1x128xf32>
    %c22 = arith.constant 22 : index
    %c0_65 = arith.constant 0 : index
    %120 = vector.load %arg0[%c22, %c0_65] : memref<51x128xf32, #tpu.memory_space<vmem>>, vector<1x128xf32>
    %121 = math.exp %120 : vector<1x128xf32>
    %122 = arith.mulf %121, %115 : vector<1x128xf32>
    %c23 = arith.constant 23 : index
    %c0_66 = arith.constant 0 : index
    %123 = vector.load %arg0[%c23, %c0_66] : memref<51x128xf32, #tpu.memory_space<vmem>>, vector<1x128xf32>
    %124 = math.exp %123 : vector<1x128xf32>
    %125 = arith.mulf %124, %117 : vector<1x128xf32>
    %c24 = arith.constant 24 : index
    %c0_67 = arith.constant 0 : index
    %126 = vector.load %arg0[%c24, %c0_67] : memref<51x128xf32, #tpu.memory_space<vmem>>, vector<1x128xf32>
    %127 = math.exp %126 : vector<1x128xf32>
    %128 = arith.mulf %127, %119 : vector<1x128xf32>
    %c41 = arith.constant 41 : index
    %c0_68 = arith.constant 0 : index
    %129 = vector.load %arg0[%c41, %c0_68] : memref<51x128xf32, #tpu.memory_space<vmem>>, vector<1x128xf32>
    %cst_69 = arith.constant 0.000000e+00 : f32
    %130 = vector.broadcast %cst_69 : f32 to vector<1x128xf32>
    %131 = arith.subf %130, %129 : vector<1x128xf32>
    %132 = math.exp %131 : vector<1x128xf32>
    %cst_70 = arith.constant 1.000000e-01 : f32
    %cst_71 = arith.constant 2.000000e+02 : f32
    %133 = vector.broadcast %cst_70 : f32 to vector<1x128xf32>
    %134 = arith.maximumf %133, %132 : vector<1x128xf32>
    %135 = vector.broadcast %cst_71 : f32 to vector<1x128xf32>
    %136 = arith.minimumf %135, %134 : vector<1x128xf32>
    %cst_72 = arith.constant 4.000000e+00 : f32
    %137 = vector.broadcast %cst_72 : f32 to vector<1x128xf32>
    %138 = arith.mulf %10, %137 : vector<1x128xf32>
    %cst_73 = arith.constant 4.000000e+00 : f32
    %139 = vector.broadcast %cst_73 : f32 to vector<1x128xf32>
    %140 = arith.mulf %12, %139 : vector<1x128xf32>
    %141 = vector.broadcast %5 : f32 to vector<1x128xf32>
    %142 = arith.subf %138, %141 : vector<1x128xf32>
    %143 = arith.mulf %142, %136 : vector<1x128xf32>
    %144 = vector.broadcast %3 : f32 to vector<1x128xf32>
    %145 = arith.divf %143, %144 : vector<1x128xf32>
    %146 = vector.broadcast %7 : f32 to vector<1x128xf32>
    %147 = arith.addf %145, %146 : vector<1x128xf32>
    %148 = vector.broadcast %6 : f32 to vector<1x128xf32>
    %149 = arith.subf %140, %148 : vector<1x128xf32>
    %150 = arith.mulf %149, %136 : vector<1x128xf32>
    %151 = vector.broadcast %4 : f32 to vector<1x128xf32>
    %152 = arith.divf %150, %151 : vector<1x128xf32>
    %153 = vector.broadcast %8 : f32 to vector<1x128xf32>
    %154 = arith.addf %152, %153 : vector<1x128xf32>
    %cst_74 = arith.constant 5.000000e-01 : f32
    %155 = vector.broadcast %cst_74 : f32 to vector<1x128xf32>
    %156 = arith.mulf %125, %155 : vector<1x128xf32>
    %157 = arith.addf %154, %156 : vector<1x128xf32>
    %cst_75 = arith.constant 0.000000e+00 : f32
    %158 = vector.broadcast %cst_75 : f32 to vector<1x128xf32>
    %c26 = arith.constant 26 : index
    %c0_76 = arith.constant 0 : index
    %159 = vector.load %arg0[%c26, %c0_76] : memref<51x128xf32, #tpu.memory_space<vmem>>, vector<1x128xf32>
    %c25 = arith.constant 25 : index
    %c0_77 = arith.constant 0 : index
    %160 = vector.load %arg0[%c25, %c0_77] : memref<51x128xf32, #tpu.memory_space<vmem>>, vector<1x128xf32>
    %161 = arith.subf %159, %160 : vector<1x128xf32>
    %c28 = arith.constant 28 : index
    %c0_78 = arith.constant 0 : index
    %162 = vector.load %arg0[%c28, %c0_78] : memref<51x128xf32, #tpu.memory_space<vmem>>, vector<1x128xf32>
    %c27 = arith.constant 27 : index
    %c0_79 = arith.constant 0 : index
    %163 = vector.load %arg0[%c27, %c0_79] : memref<51x128xf32, #tpu.memory_space<vmem>>, vector<1x128xf32>
    %164 = arith.subf %162, %163 : vector<1x128xf32>
    %165 = arith.cmpf ogt, %164, %161 : vector<1x128xf32>
    %cst_80 = arith.constant 1.000000e+00 : f32
    %166 = vector.broadcast %cst_80 : f32 to vector<1x128xf32>
    %167 = arith.select %165, %166, %158 : vector<1x128xi1>, vector<1x128xf32>
    %168 = arith.select %165, %164, %161 : vector<1x128xi1>, vector<1x128xf32>
    %c30 = arith.constant 30 : index
    %c0_81 = arith.constant 0 : index
    %169 = vector.load %arg0[%c30, %c0_81] : memref<51x128xf32, #tpu.memory_space<vmem>>, vector<1x128xf32>
    %c29 = arith.constant 29 : index
    %c0_82 = arith.constant 0 : index
    %170 = vector.load %arg0[%c29, %c0_82] : memref<51x128xf32, #tpu.memory_space<vmem>>, vector<1x128xf32>
    %171 = arith.subf %169, %170 : vector<1x128xf32>
    %172 = arith.cmpf ogt, %171, %168 : vector<1x128xf32>
    %cst_83 = arith.constant 2.000000e+00 : f32
    %173 = vector.broadcast %cst_83 : f32 to vector<1x128xf32>
    %174 = arith.select %172, %173, %167 : vector<1x128xi1>, vector<1x128xf32>
    %175 = arith.select %172, %171, %168 : vector<1x128xi1>, vector<1x128xf32>
    %c32 = arith.constant 32 : index
    %c0_84 = arith.constant 0 : index
    %176 = vector.load %arg0[%c32, %c0_84] : memref<51x128xf32, #tpu.memory_space<vmem>>, vector<1x128xf32>
    %c31 = arith.constant 31 : index
    %c0_85 = arith.constant 0 : index
    %177 = vector.load %arg0[%c31, %c0_85] : memref<51x128xf32, #tpu.memory_space<vmem>>, vector<1x128xf32>
    %178 = arith.subf %176, %177 : vector<1x128xf32>
    %179 = arith.cmpf ogt, %178, %175 : vector<1x128xf32>
    %cst_86 = arith.constant 3.000000e+00 : f32
    %180 = vector.broadcast %cst_86 : f32 to vector<1x128xf32>
    %181 = arith.select %179, %180, %174 : vector<1x128xi1>, vector<1x128xf32>
    %c33 = arith.constant 33 : index
    %c0_87 = arith.constant 0 : index
    %182 = vector.load %arg0[%c33, %c0_87] : memref<51x128xf32, #tpu.memory_space<vmem>>, vector<1x128xf32>
    %c34 = arith.constant 34 : index
    %c0_88 = arith.constant 0 : index
    %183 = vector.load %arg0[%c34, %c0_88] : memref<51x128xf32, #tpu.memory_space<vmem>>, vector<1x128xf32>
    %cst_89 = arith.constant 0.000000e+00 : f32
    %184 = vector.broadcast %cst_89 : f32 to vector<1x128xf32>
    %cst_90 = arith.constant 1.000000e+00 : f32
    %185 = vector.broadcast %cst_90 : f32 to vector<1x128xf32>
    %186 = arith.cmpf oeq, %181, %185 : vector<1x128xf32>
    %c35 = arith.constant 35 : index
    %c0_91 = arith.constant 0 : index
    %187 = vector.load %arg0[%c35, %c0_91] : memref<51x128xf32, #tpu.memory_space<vmem>>, vector<1x128xf32>
    %188 = arith.select %186, %187, %182 : vector<1x128xi1>, vector<1x128xf32>
    %c36 = arith.constant 36 : index
    %c0_92 = arith.constant 0 : index
    %189 = vector.load %arg0[%c36, %c0_92] : memref<51x128xf32, #tpu.memory_space<vmem>>, vector<1x128xf32>
    %190 = arith.select %186, %189, %183 : vector<1x128xi1>, vector<1x128xf32>
    %cst_93 = arith.constant 1.57079637 : f32
    %191 = vector.broadcast %cst_93 : f32 to vector<1x128xf32>
    %192 = arith.select %186, %191, %184 : vector<1x128xi1>, vector<1x128xf32>
    %cst_94 = arith.constant 2.000000e+00 : f32
    %193 = vector.broadcast %cst_94 : f32 to vector<1x128xf32>
    %194 = arith.cmpf oeq, %181, %193 : vector<1x128xf32>
    %c37 = arith.constant 37 : index
    %c0_95 = arith.constant 0 : index
    %195 = vector.load %arg0[%c37, %c0_95] : memref<51x128xf32, #tpu.memory_space<vmem>>, vector<1x128xf32>
    %196 = arith.select %194, %195, %188 : vector<1x128xi1>, vector<1x128xf32>
    %c38 = arith.constant 38 : index
    %c0_96 = arith.constant 0 : index
    %197 = vector.load %arg0[%c38, %c0_96] : memref<51x128xf32, #tpu.memory_space<vmem>>, vector<1x128xf32>
    %198 = arith.select %194, %197, %190 : vector<1x128xi1>, vector<1x128xf32>
    %cst_97 = arith.constant 3.14159274 : f32
    %199 = vector.broadcast %cst_97 : f32 to vector<1x128xf32>
    %200 = arith.select %194, %199, %192 : vector<1x128xi1>, vector<1x128xf32>
    %cst_98 = arith.constant 3.000000e+00 : f32
    %201 = vector.broadcast %cst_98 : f32 to vector<1x128xf32>
    %202 = arith.cmpf oeq, %181, %201 : vector<1x128xf32>
    %c39 = arith.constant 39 : index
    %c0_99 = arith.constant 0 : index
    %203 = vector.load %arg0[%c39, %c0_99] : memref<51x128xf32, #tpu.memory_space<vmem>>, vector<1x128xf32>
    %204 = arith.select %202, %203, %196 : vector<1x128xi1>, vector<1x128xf32>
    %c40 = arith.constant 40 : index
    %c0_100 = arith.constant 0 : index
    %205 = vector.load %arg0[%c40, %c0_100] : memref<51x128xf32, #tpu.memory_space<vmem>>, vector<1x128xf32>
    %206 = arith.select %202, %205, %198 : vector<1x128xi1>, vector<1x128xf32>
    %cst_101 = arith.constant -1.57079637 : f32
    %207 = vector.broadcast %cst_101 : f32 to vector<1x128xf32>
    %208 = arith.select %202, %207, %200 : vector<1x128xi1>, vector<1x128xf32>
    %c6 = arith.constant 6 : index
    %c0_102 = arith.constant 0 : index
    %209 = vector.load %arg0[%c6, %c0_102] : memref<51x128xf32, #tpu.memory_space<vmem>>, vector<1x128xf32>
    %210 = arith.addf %209, %0 : vector<1x128xf32>
    %cst_103 = arith.constant 4.000000e+00 : f32
    %211 = vector.broadcast %cst_103 : f32 to vector<1x128xf32>
    %212 = arith.mulf %210, %211 : vector<1x128xf32>
    %c7 = arith.constant 7 : index
    %c0_104 = arith.constant 0 : index
    %213 = vector.load %arg0[%c7, %c0_104] : memref<51x128xf32, #tpu.memory_space<vmem>>, vector<1x128xf32>
    %214 = arith.addf %213, %1 : vector<1x128xf32>
    %cst_105 = arith.constant 4.000000e+00 : f32
    %215 = vector.broadcast %cst_105 : f32 to vector<1x128xf32>
    %216 = arith.mulf %214, %215 : vector<1x128xf32>
    %c8 = arith.constant 8 : index
    %c0_106 = arith.constant 0 : index
    %217 = vector.load %arg0[%c8, %c0_106] : memref<51x128xf32, #tpu.memory_space<vmem>>, vector<1x128xf32>
    %218 = arith.addf %217, %0 : vector<1x128xf32>
    %cst_107 = arith.constant 4.000000e+00 : f32
    %219 = vector.broadcast %cst_107 : f32 to vector<1x128xf32>
    %220 = arith.mulf %218, %219 : vector<1x128xf32>
    %c9 = arith.constant 9 : index
    %c0_108 = arith.constant 0 : index
    %221 = vector.load %arg0[%c9, %c0_108] : memref<51x128xf32, #tpu.memory_space<vmem>>, vector<1x128xf32>
    %222 = arith.addf %221, %1 : vector<1x128xf32>
    %cst_109 = arith.constant 4.000000e+00 : f32
    %223 = vector.broadcast %cst_109 : f32 to vector<1x128xf32>
    %224 = arith.mulf %222, %223 : vector<1x128xf32>
    %c10 = arith.constant 10 : index
    %c0_110 = arith.constant 0 : index
    %225 = vector.load %arg0[%c10, %c0_110] : memref<51x128xf32, #tpu.memory_space<vmem>>, vector<1x128xf32>
    %226 = arith.addf %225, %0 : vector<1x128xf32>
    %cst_111 = arith.constant 4.000000e+00 : f32
    %227 = vector.broadcast %cst_111 : f32 to vector<1x128xf32>
    %228 = arith.mulf %226, %227 : vector<1x128xf32>
    %c11 = arith.constant 11 : index
    %c0_112 = arith.constant 0 : index
    %229 = vector.load %arg0[%c11, %c0_112] : memref<51x128xf32, #tpu.memory_space<vmem>>, vector<1x128xf32>
    %230 = arith.addf %229, %1 : vector<1x128xf32>
    %cst_113 = arith.constant 4.000000e+00 : f32
    %231 = vector.broadcast %cst_113 : f32 to vector<1x128xf32>
    %232 = arith.mulf %230, %231 : vector<1x128xf32>
    %c12 = arith.constant 12 : index
    %c0_114 = arith.constant 0 : index
    %233 = vector.load %arg0[%c12, %c0_114] : memref<51x128xf32, #tpu.memory_space<vmem>>, vector<1x128xf32>
    %234 = arith.addf %233, %0 : vector<1x128xf32>
    %cst_115 = arith.constant 4.000000e+00 : f32
    %235 = vector.broadcast %cst_115 : f32 to vector<1x128xf32>
    %236 = arith.mulf %234, %235 : vector<1x128xf32>
    %c13 = arith.constant 13 : index
    %c0_116 = arith.constant 0 : index
    %237 = vector.load %arg0[%c13, %c0_116] : memref<51x128xf32, #tpu.memory_space<vmem>>, vector<1x128xf32>
    %238 = arith.addf %237, %1 : vector<1x128xf32>
    %cst_117 = arith.constant 4.000000e+00 : f32
    %239 = vector.broadcast %cst_117 : f32 to vector<1x128xf32>
    %240 = arith.mulf %238, %239 : vector<1x128xf32>
    %c14 = arith.constant 14 : index
    %c0_118 = arith.constant 0 : index
    %241 = vector.load %arg0[%c14, %c0_118] : memref<51x128xf32, #tpu.memory_space<vmem>>, vector<1x128xf32>
    %c15 = arith.constant 15 : index
    %c0_119 = arith.constant 0 : index
    %242 = vector.load %arg0[%c15, %c0_119] : memref<51x128xf32, #tpu.memory_space<vmem>>, vector<1x128xf32>
    %243 = arith.cmpf olt, %241, %242 : vector<1x128xf32>
    %244 = arith.extui %243 : vector<1x128xi1> to vector<1x128xi32>
    %245 = arith.sitofp %244 : vector<1x128xi32> to vector<1x128xf32>
    %c16 = arith.constant 16 : index
    %c0_120 = arith.constant 0 : index
    %246 = vector.load %arg0[%c16, %c0_120] : memref<51x128xf32, #tpu.memory_space<vmem>>, vector<1x128xf32>
    %c17 = arith.constant 17 : index
    %c0_121 = arith.constant 0 : index
    %247 = vector.load %arg0[%c17, %c0_121] : memref<51x128xf32, #tpu.memory_space<vmem>>, vector<1x128xf32>
    %248 = arith.cmpf olt, %246, %247 : vector<1x128xf32>
    %249 = arith.extui %248 : vector<1x128xi1> to vector<1x128xi32>
    %250 = arith.sitofp %249 : vector<1x128xi32> to vector<1x128xf32>
    %c18 = arith.constant 18 : index
    %c0_122 = arith.constant 0 : index
    %251 = vector.load %arg0[%c18, %c0_122] : memref<51x128xf32, #tpu.memory_space<vmem>>, vector<1x128xf32>
    %c19 = arith.constant 19 : index
    %c0_123 = arith.constant 0 : index
    %252 = vector.load %arg0[%c19, %c0_123] : memref<51x128xf32, #tpu.memory_space<vmem>>, vector<1x128xf32>
    %253 = arith.cmpf olt, %251, %252 : vector<1x128xf32>
    %254 = arith.extui %253 : vector<1x128xi1> to vector<1x128xi32>
    %255 = arith.sitofp %254 : vector<1x128xi32> to vector<1x128xf32>
    %c20 = arith.constant 20 : index
    %c0_124 = arith.constant 0 : index
    %256 = vector.load %arg0[%c20, %c0_124] : memref<51x128xf32, #tpu.memory_space<vmem>>, vector<1x128xf32>
    %c21 = arith.constant 21 : index
    %c0_125 = arith.constant 0 : index
    %257 = vector.load %arg0[%c21, %c0_125] : memref<51x128xf32, #tpu.memory_space<vmem>>, vector<1x128xf32>
    %258 = arith.cmpf olt, %256, %257 : vector<1x128xf32>
    %259 = arith.extui %258 : vector<1x128xi1> to vector<1x128xi32>
    %260 = arith.sitofp %259 : vector<1x128xi32> to vector<1x128xf32>
    %cst_126 = arith.constant 0.000000e+00 : f32
    %261 = vector.broadcast %cst_126 : f32 to vector<1x128xf32>
    %c42 = arith.constant 42 : index
    %c0_127 = arith.constant 0 : index
    %262 = vector.load %arg0[%c42, %c0_127] : memref<51x128xf32, #tpu.memory_space<vmem>>, vector<1x128xf32>
    %c43 = arith.constant 43 : index
    %c0_128 = arith.constant 0 : index
    %263 = vector.load %arg0[%c43, %c0_128] : memref<51x128xf32, #tpu.memory_space<vmem>>, vector<1x128xf32>
    %264 = arith.cmpf ogt, %263, %262 : vector<1x128xf32>
    %cst_129 = arith.constant 1.000000e+00 : f32
    %265 = vector.broadcast %cst_129 : f32 to vector<1x128xf32>
    %266 = arith.select %264, %265, %261 : vector<1x128xi1>, vector<1x128xf32>
    %267 = arith.select %264, %263, %262 : vector<1x128xi1>, vector<1x128xf32>
    %c44 = arith.constant 44 : index
    %c0_130 = arith.constant 0 : index
    %268 = vector.load %arg0[%c44, %c0_130] : memref<51x128xf32, #tpu.memory_space<vmem>>, vector<1x128xf32>
    %269 = arith.cmpf ogt, %268, %267 : vector<1x128xf32>
    %cst_131 = arith.constant 2.000000e+00 : f32
    %270 = vector.broadcast %cst_131 : f32 to vector<1x128xf32>
    %271 = arith.select %269, %270, %266 : vector<1x128xi1>, vector<1x128xf32>
    %272 = arith.select %269, %268, %267 : vector<1x128xi1>, vector<1x128xf32>
    %c45 = arith.constant 45 : index
    %c0_132 = arith.constant 0 : index
    %273 = vector.load %arg0[%c45, %c0_132] : memref<51x128xf32, #tpu.memory_space<vmem>>, vector<1x128xf32>
    %274 = arith.cmpf ogt, %273, %272 : vector<1x128xf32>
    %cst_133 = arith.constant 3.000000e+00 : f32
    %275 = vector.broadcast %cst_133 : f32 to vector<1x128xf32>
    %276 = arith.select %274, %275, %271 : vector<1x128xi1>, vector<1x128xf32>
    %277 = arith.select %274, %273, %272 : vector<1x128xi1>, vector<1x128xf32>
    %c46 = arith.constant 46 : index
    %c0_134 = arith.constant 0 : index
    %278 = vector.load %arg0[%c46, %c0_134] : memref<51x128xf32, #tpu.memory_space<vmem>>, vector<1x128xf32>
    %279 = arith.cmpf ogt, %278, %277 : vector<1x128xf32>
    %cst_135 = arith.constant 4.000000e+00 : f32
    %280 = vector.broadcast %cst_135 : f32 to vector<1x128xf32>
    %281 = arith.select %279, %280, %276 : vector<1x128xi1>, vector<1x128xf32>
    %cst_136 = arith.constant 0.000000e+00 : f32
    %282 = vector.broadcast %cst_136 : f32 to vector<1x128xf32>
    %283 = tpu.concatenate %22, %32, %42, %52, %125, %128, %122, %136 in 0 : vector<1x128xf32>, vector<1x128xf32>, vector<1x128xf32>, vector<1x128xf32>, vector<1x128xf32>, vector<1x128xf32>, vector<1x128xf32>, vector<1x128xf32> -> vector<8x128xf32>
    %c0_137 = arith.constant 0 : index
    %c0_138 = arith.constant 0 : index
    %284 = vector.load %arg2[%c0_137, %c0_138] : memref<32x128xf32, #tpu.memory_space<vmem>>, vector<8x128xf32>
    tpu.vector_store %arg2[%c0_137, %c0_138], %283 {strides = array<i32>} : memref<32x128xf32, #tpu.memory_space<vmem>>, vector<8x128xf32>,
    %285 = tpu.concatenate %147, %157, %136, %204, %206, %208, %212, %216 in 0 : vector<1x128xf32>, vector<1x128xf32>, vector<1x128xf32>, vector<1x128xf32>, vector<1x128xf32>, vector<1x128xf32>, vector<1x128xf32>, vector<1x128xf32> -> vector<8x128xf32>
    %c8_139 = arith.constant 8 : index
    %c0_140 = arith.constant 0 : index
    %286 = vector.load %arg2[%c8_139, %c0_140] : memref<32x128xf32, #tpu.memory_space<vmem>>, vector<8x128xf32>
    tpu.vector_store %arg2[%c8_139, %c0_140], %285 {strides = array<i32>} : memref<32x128xf32, #tpu.memory_space<vmem>>, vector<8x128xf32>,
    %287 = tpu.concatenate %220, %224, %228, %232, %236, %240, %245, %250 in 0 : vector<1x128xf32>, vector<1x128xf32>, vector<1x128xf32>, vector<1x128xf32>, vector<1x128xf32>, vector<1x128xf32>, vector<1x128xf32>, vector<1x128xf32> -> vector<8x128xf32>
    %c16_141 = arith.constant 16 : index
    %c0_142 = arith.constant 0 : index
    %288 = vector.load %arg2[%c16_141, %c0_142] : memref<32x128xf32, #tpu.memory_space<vmem>>, vector<8x128xf32>
    tpu.vector_store %arg2[%c16_141, %c0_142], %287 {strides = array<i32>} : memref<32x128xf32, #tpu.memory_space<vmem>>, vector<8x128xf32>,
    %cst_143 = arith.constant 4.000000e+00 : f32
    %289 = vector.broadcast %cst_143 : f32 to vector<1x128xf32>
    %290 = arith.mulf %0, %289 : vector<1x128xf32>
    %cst_144 = arith.constant 4.000000e+00 : f32
    %291 = vector.broadcast %cst_144 : f32 to vector<1x128xf32>
    %292 = arith.mulf %1, %291 : vector<1x128xf32>
    %293 = tpu.concatenate %255, %260, %281, %290, %292, %282, %282, %282 in 0 : vector<1x128xf32>, vector<1x128xf32>, vector<1x128xf32>, vector<1x128xf32>, vector<1x128xf32>, vector<1x128xf32>, vector<1x128xf32>, vector<1x128xf32> -> vector<8x128xf32>
    %c24_145 = arith.constant 24 : index
    %c0_146 = arith.constant 0 : index
    %294 = vector.load %arg2[%c24_145, %c0_146] : memref<32x128xf32, #tpu.memory_space<vmem>>, vector<8x128xf32>
    tpu.vector_store %arg2[%c24_145, %c0_146], %293 {strides = array<i32>} : memref<32x128xf32, #tpu.memory_space<vmem>>, vector<8x128xf32>,
    return
  }
}

</mosaic_0001>

<bundles_post_ra>
// kernel: device_pipeline.2
= control target key start
LH: loop header
LB: loop body
LE: loop exit
PB: predicated region body
PF: predicated region fallthrough
CT: control target
= control target key end

     0   :  { %6 = vsyncpa [#allocation3], 0  ;;  %s718_s0 = inlined_call_operand.hbm [shape: f32[1,3,16,128], index: 0, kind: input, shape index: {}]   ;;  %s719_s1 = inlined_call_operand.vmem [shape: f32[1,3,16,128], index: 1, kind: output, shape index: {}]  }
   0x1   :  { %8 = vsyncpa [#allocation3 + $0x1], 0  ;;  %s565_s6 = smov 0   ;;  %s567_s7 = smov 0  }
   0x2   :  { %s569_s8 = smov 0   ;;  %s571_s9 = smov 0  }
   0x3   :  { %s573_s10 = smov 0   ;;  %s575_s11 = smov 0  }
   0x4 LB: > { %s390_s12 = sadd.s32 4294967295, %s546_s11   ;;  %s23_s13 = sadd.s32 1, %s542_s10  ;;  %s546_s11 = sphi %s575_s11, %s14_s11   ;;  %s542_s10 = sphi %s573_s10, %s727_s10   ;;  %s538_s9 = sphi %s571_s9, %s726_s9   ;;  %s534_s8 = sphi %s569_s8, %s725_s8   ;;  %s530_s7 = sphi %s567_s7, %s724_s7   ;;  %s526_s6 = sphi %s565_s6, %s723_s6  }
   0x5   : > { %p24_p0 = scmp.ge.s32.totalorder %s23_s13, 3  ;;  %s35_s14 = sadd.s32 1, %s534_s8 }
   0x6   : > { %p42_p1 = scmp.ne.s32.totalorder %s534_s8, %s530_s7  ;;  %p43_p2 = scmp.eq.s32.totalorder %s546_s11, 0 }
   0x7   : > { %s729_s13 = smov (%p24_p0, %s23_s13), 0  ;;  %p48_p4 = scmp.ne.s32.totalorder %s530_s7, %s526_s6 }
   0x8   : > { %p601_p3 = por %p43_p2, %p42_p1  ;;  %s31_s16 = ssub.s32 %s542_s10, %s729_s13 }
   0x9   : > { %p49_p5 = scmp.eq.s32.totalorder %s390_s12, 0  ;;  %p33_p6 = scmp.eq.s32.totalorder %s31_s16, 0 }
   0xa   : > { %p411_p8 = scmp.lt.s32.totalorder %s546_s11, 3  ;;  %s100_s19 = sand.u32 1, %s534_s8  }
   0xb   : > { %p608_p7 = por %p49_p5, %p48_p4  ;;  %s403_s20 = sshll.u32 %s542_s10, 8 }
   0xc   : > { %s614_s18 = scalar_select %p33_p6, %s534_s8, %s35_s14  }
   0xd   : > { %s394_s21 = sshll.u32 %s100_s19, 4  ;;  %s621_s24 = scalar_lea.hbm %s718_s0, %s403_s20 }
   0xe   : > { %s104_s25 = scalar_lea.vmem [#allocation2], %s394_s21  ;;  %p625_p9 = pnand %p411_p8, %p601_p3 }
   0xf   : > { %s113_s26 = sshll.u32 %s104_s25, 4  ;;  %s631_s28 = scalar_lea.sflag [#allocation3], %s100_s19  ;;  %s629_s26 = int_to_ptr.vmem [resolvable:$true] %s113_s26 }
  0x10   : > { %s466_s29 = scalar_lea.hbm %s621_s24, 256  ;;  %p468_p11 = pneg %p625_p9 }
  0x11   : > { %p467_p10 = scmp.ne.s32.totalorder %s621_s24, %s466_s29  ;;  %s471_s3 = scalar_lea.hbm %s718_s0, 768 }
  0x12   : > { %p472_p0 = scmp.lt.u32.totalorder %s621_s24, %s718_s0  ;;  %p473_p1 = scmp.lt.u32.totalorder %s471_s3, %s466_s29 }
  0x13   : > { %p469_p12 = pnand %p468_p11, %p467_p10  ;;  %p475_p3 = scmp.lt.u32.totalorder %s466_s29, %s621_s24 }
  0x14   : > { %p474_p2 = por %p473_p1, %p472_p0 }
  0x15   : > { %p470_p13 = pneg %p469_p12 }
  0x16   : > { %p476_p4 = por %p475_p3, %p474_p2 }
  0x18   : > { %p477_p5 = pnand %p476_p4, %p470_p13 }
  0x1a   : > { %480 = shalt.err (!%p477_p5)
}
  0x1b   : > { %s481_s6 = scalar_lea.vmem %s629_s26, 256  ;;  %s548_s12 = smov [#allocation2]  }
  0x1c   : > { %p482_p6 = scmp.ne.s32.totalorder %s629_s26, %s481_s6  ;;  %s486_s14 = sshll.u32 %s548_s12, 4  ;;  %s487_s14 = int_to_ptr.vmem [resolvable:$false] %s486_s14 }
  0x1d   : > { %s488_s15 = scalar_lea.vmem %s487_s14, 512  ;;  %p489_p12 = scmp.lt.s32.totalorder %s629_s26, %s487_s14 }
  0x1e   : > { %p484_p8 = pnand %p482_p6, %p468_p11  ;;  %p490_p0 = scmp.lt.s32.totalorder %s488_s15, %s481_s6 }
  0x20   : > { %p485_p10 = pneg %p484_p8  ;;  %p491_p1 = por %p490_p0, %p489_p12 }
  0x22   : > { %p492_p2 = pnand %p491_p1, %p485_p10 }
  0x24   : > { %495 = shalt.err (!%p492_p2)
}
  0x25   : > { %s549_s16 = smov 128   ;;  %s550_s19 = smov 8  }
  0x26   : > { %410 = dma.hbm_to_vmem [thread:$0]  (!%p625_p9), %s621_s24, 256, %s629_s26, %s631_s28, %s549_s16, %s549_s16, %s550_s19  }
  0x27   : > { %p397_p11 = scmp.ge.s32.totalorder %s546_s11, 1  ;;  %p121_p13 = scmp.lt.s32.totalorder %s546_s11, 4 }
  0x29   : > { %p122_p3 = pnand %p397_p11, %p121_p13 }
  0x2a   : > { %s127_s20 = sand.u32 (!%p122_p3), 1, %s530_s7  }
  0x2b   : > { %125 = sbr.rel (%p122_p3) target bundleno = 197 (0xc5), region = 24  ;;  %s398_s21 = sshll.u32 (!%p122_p3), %s127_s20, 4 }
  0x2c   : > { %s128_s22 = scalar_lea.sflag (!%p122_p3), [#allocation3], %s127_s20  ;;  %s131_s23 = scalar_lea.vmem (!%p122_p3), [#allocation2], %s398_s21 }
  0x32   : > { %521 = dma.done.wait (%p608_p7), %s128_s22, 256  }
  0x33   : > { %523 = vsyncadd (%p608_p7), %s128_s22, 4294967040  ;;  %v666_v0 = vld [vmem:[%s131_s23] sm:$0xff]  ;;  %s551_s25 = smov 1   ;;  %s552_s24 = smov 2   ;;  %v670_v1 = vld [vmem:[%s131_s23 + $0x8] sm:$0xff]  ;;  %v165_v2 = vlaneseq }
  0x34   : > { %179 = vrot.lane.b32.xlu1 %v666_v0, %s551_s25  ;;  %167 = vrot.lane.b32.xlu0 %v666_v0, %s552_s24  ;;  %s553_s26 = smov 127   ;;  %s554_s17 = smov 126  }
  0x35   : > { %v166_v3 = vand.u32 127, %v165_v2  ;;  %v216_v17 = vshrl.u32 %v165_v2, 7  ;;  %p156_p7 = scmp.lt.s32.totalorder %s538_s9, 2 }
  0x37   : > { %v171_v4 = vadd.s32 4294967294, %v166_v3  ;;  %v183_v7 = vadd.s32 4294967295, %v166_v3  ;;  %v195_v8 = vadd.s32 1, %v166_v3  ;;  %v207_v13 = vadd.s32 2, %v166_v3  ;;  %s731_s9 = smov (!%p156_p7, %s538_s9), 2 }
  0x38   : > { %181 = vrot.lane.b32.xlu1 %v670_v1, %s551_s25  ;;  %169 = vrot.lane.b32.xlu0 %v670_v1, %s552_s24  ;;  %v217_v28 = vadd.s32 8, %v216_v17  ;;  %v223_v29 = vadd.s32 4294967294, %v216_v17  ;;  %vm220_vm4 = vcmp.lt.s32.totalorder %v216_v17, 2  ;;  %vm237_vm5 = vcmp.lt.s32.totalorder %v216_v17, 1  ;;  %s404_s27 = sshll.u32 %s731_s9, 4 }
  0x39   : > { %vm172_vm0 = vcmp.ge.s32.totalorder %v171_v4, 0  ;;  %vm184_vm1 = vcmp.ge.s32.totalorder %v183_v7, 0  ;;  %vm197_vm2 = vcmp.lt.s32.totalorder %v195_v8, 128  ;;  %vm209_vm3 = vcmp.lt.s32.totalorder %v207_v13, 128  ;;  %s162_s30 = scalar_lea.vmem %s719_s1, %s404_s27 }
  0x3a   : > { %v240_v35 = vadd.s32 4294967295, %v216_v17  ;;  %vm254_vm6 = vcmp.lt.s32.totalorder %v216_v17, 7  ;;  %vm225_vm7 = vcmp.ge.s32.totalorder %v223_v29, 0  ;;  %v258_v38 = vadd.s32 1, %v217_v28 }
  0x3b   : > { %vm271_vm8 = vcmp.lt.s32.totalorder %v216_v17, 6  ;;  %v275_v44 = vadd.s32 2, %v217_v28 }
  0x3c   : > { %193 = vrot.lane.b32.xlu1 %v670_v1, %s553_s26  ;;  %191 = vrot.lane.b32.xlu0 %v666_v0, %s553_s26  ;;  %vm242_vm9 = vcmp.ge.s32.totalorder %v240_v35, 0  ;;  %vm262_vm10 = vcmp.lt.s32.totalorder %v258_v38, 16 }
  0x3d   : > { %vm279_vm11 = vcmp.lt.s32.totalorder %v275_v44, 16 }
  0x40   : > { %205 = vrot.lane.b32.xlu1 %v670_v1, %s554_s17  ;;  %203 = vrot.lane.b32.xlu0 %v666_v0, %s554_s17 }
  0xa6   : > { %v180_v5 = vpop.permute.xlu1 %179  ;;  %v168_v6 = vpop.permute.xlu0 %167 }
  0xa7   : > { %v175_v9 = vsel %vm172_vm0, %v168_v6, -inf  ;;  %v187_v21 = vsel %vm184_vm1, %v180_v5, -inf }
  0xa8   : > { %v177_v14 = vmax.f32 %v666_v0, %v175_v9 }
  0xaa   : > { %v182_v10 = vpop.permute.xlu1 %181  ;;  %v170_v11 = vpop.permute.xlu0 %169  ;;  %v189_v24 = vmax.f32 %v177_v14, %v187_v21 }
  0xab   : > { %v176_v12 = vsel %vm172_vm0, %v170_v11, -inf  ;;  %v188_v16 = vsel %vm184_vm1, %v182_v10, -inf }
  0xac   : > { %v178_v15 = vmax.f32 %v670_v1, %v176_v12 }
  0xae   : > { %v194_v18 = vpop.permute.xlu1 %193  ;;  %v190_v19 = vmax.f32 %v178_v15, %v188_v16  ;;  %v192_v20 = vpop.permute.xlu0 %191 }
  0xaf   : > { %v200_v22 = vsel %vm197_vm2, %v194_v18, -inf  ;;  %v199_v23 = vsel %vm197_vm2, %v192_v20, -inf }
  0xb0   : > { %v202_v25 = vmax.f32 %v190_v19, %v200_v22  ;;  %v201_v26 = vmax.f32 %v189_v24, %v199_v23 }
  0xb2   : > { %v206_v27 = vpop.permute.xlu1 %205  ;;  %v204_v30 = vpop.permute.xlu0 %203 }
  0xb3   : > { %v212_v31 = vsel %vm209_vm3, %v206_v27, -inf  ;;  %v211_v32 = vsel %vm209_vm3, %v204_v30, -inf }
  0xb4   : > { %v214_v33 = vmax.f32 %v202_v25, %v212_v31  ;;  %v213_v34 = vmax.f32 %v201_v26, %v211_v32 }
  0xb6   : > { %v219_v36 = vrot.slane %v214_v33, 6  ;;  %v236_v37 = vrot.slane %v214_v33, 7  ;;  %v253_v39 = vrot.slane %v214_v33, 1  ;;  %v218_v40 = vrot.slane %v213_v34, 6 }
  0xb7   : > { %v235_v41 = vrot.slane %v213_v34, 7  ;;  %v252_v42 = vrot.slane %v213_v34, 1  ;;  %v270_v43 = vrot.slane %v214_v33, 2  ;;  %v269_v45 = vrot.slane %v213_v34, 2 }
  0xb8   : > { %v221_v46 = vsel %vm220_vm4, %v218_v40, %v219_v36  ;;  %v222_v47 = vsel %vm220_vm4, %v219_v36, %v218_v40 }
  0xb9   : > { %v239_v48 = vsel %vm237_vm5, %v236_v37, %v235_v41  ;;  %v231_v49 = vsel %vm225_vm7, %v222_v47, -inf  ;;  %v234_v50 = vmax.f32 %v214_v33, %v221_v46  ;;  %v238_v52 = vsel %vm237_vm5, %v235_v41, %v236_v37 }
  0xba   : > { %v233_v51 = vmax.f32 %v213_v34, %v231_v49  ;;  %v256_v53 = vsel %vm254_vm6, %v253_v39, %v252_v42  ;;  %v248_v54 = vsel %vm242_vm9, %v239_v48, -inf  ;;  %v273_v56 = vsel %vm271_vm8, %v270_v43, %v269_v45 }
  0xbb   : > { %v251_v55 = vmax.f32 %v234_v50, %v238_v52  ;;  %v266_v58 = vsel %vm262_vm10, %v256_v53, -inf  ;;  %v255_v59 = vsel %vm254_vm6, %v252_v42, %v253_v39  ;;  %v283_v62 = vsel %vm279_vm11, %v273_v56, -inf }
  0xbc   : > { %v250_v57 = vmax.f32 %v233_v51, %v248_v54  ;;  %v272_v63 = vsel %vm271_vm8, %v269_v45, %v270_v43 }
  0xbd   : > { %v268_v60 = vmax.f32 %v251_v55, %v266_v58 }
  0xbe   : > { %v267_v61 = vmax.f32 %v250_v57, %v255_v59 }
  0xbf   : > { %v285_v2 = vmax.f32 %v268_v60, %v283_v62 }
  0xc0   : > { %v284_v3 = vmax.f32 %v267_v61, %v272_v63 }
  0xc1   : > { %vm287_vm12 = vcmp.eq.f32.partialorder %v285_v2, %v670_v1 }
  0xc2   : > { %vm286_vm13 = vcmp.eq.f32.partialorder %v284_v3, %v666_v0  ;;  %v289_v4 = vsel %vm287_vm12, %v670_v1, 0.0 }
  0xc3   : > { %v288_v5 = vsel %vm286_vm13, %v666_v0, 0.0  ;;  %291 = vst [vmem:[%s162_s30 + $0x8] sm:$0xff] %v289_v4 }
  0xc4   : > { %290 = vst [vmem:[%s162_s30] sm:$0xff] %v288_v5 }
  0xc5 PF: > { %s14_s11 = sadd.s32 1, %s546_s11   ;;  %s723_s6 = smov %s530_s7 }
  0xc6   : > { %p11_p9 = scmp.ge.s32.totalorder %s14_s11, 5   ;;  %s724_s7 = smov %s534_s8 }
  0xc7   : > { %s725_s8 = smov %s614_s18  ;;  %s726_s9 = smov %s542_s10 }
  0xc8   : > { %s727_s10 = smov %s729_s13  ;;  %13 = sbr.rel (!%p11_p9) target bundleno = 4 (0x4), region = 64 }
  0xcf   :  { %321 = vsyncpa [#allocation3], 1 }
  0xd0   :  { %323 = vsyncpa [#allocation3 + $0x1], 1 }

// kernel: device_pipeline.3
= control target key start
LH: loop header
LB: loop body
LE: loop exit
PB: predicated region body
PF: predicated region fallthrough
CT: control target
= control target key end

     0   :  { %7 = vsyncpa [#allocation3], 0  ;;  %s769_s0 = inlined_call_operand.vmem [shape: f32[51,128], index: 0, kind: input, shape index: {}]   ;;  %s770_s1 = inlined_call_operand.vmem [shape: f32[8], index: 1, kind: input, shape index: {}]   ;;  %s771_s2 = inlined_call_operand.vmem [shape: f32[32,128], index: 2, kind: output, shape index: {}]  }
   0x1   :  { %s16_s11 = sshll.u32 %s770_s1, 4  ;;  %s17_s11 = int_to_ptr.vmem [resolvable:$true] %s16_s11 }
   0x2   :  { %s377_s12 = scalar_lea.vmem %s17_s11, 16  ;;  %p382_p1 = scmp.lt.s32.totalorder %s17_s11, %s17_s11 }
   0x3   :  { %p378_p0 = scmp.ne.s32.totalorder %s17_s11, %s377_s12  ;;  %p383_p2 = scmp.lt.s32.totalorder %s377_s12, %s377_s12 }
   0x5   :  { %p384_p3 = por %p383_p2, %p382_p1 }
   0x7   :  { %p385_p4 = pnand %p384_p3, %p378_p0 }
   0x9   :  { %388 = shalt.err (!%p385_p4)
}
   0xa   :  { %s391_s13 = smov [#allocation2]  }
   0xb   :  { %19 = dma.vmem_to_smem %s17_s11, 16, %s391_s13, [#allocation3]  }
   0xc   :  { %389 = dma.done.wait [#allocation3], 16  }
   0xd   :  { %390 = vsyncadd [#allocation3], 4294967280 }
   0xe   :  { %23 = sfence }
   0xf   :  { %v417_v0 = vld [vmem:[%s769_s0 + $0x30] sm:$0x1]  ;;  %v422_v1 = vld [vmem:[%s769_s0 + $0x31] sm:$0x1]  ;;  %v427_v2 = vld [vmem:[%s769_s0 + $0x32] sm:$0x1] }
  0x10   :  { %v33_v3 = vld [vmem:[%s769_s0 + $0x4] sm:$0x1]  ;;  %s432_s21 = sld [smem:[#allocation2]]  ;;  %s434_s22 = sld [smem:[#allocation2 + $0x1]]  ;;  %v35_v4 = vld [vmem:[%s769_s0 + $0x5] sm:$0x1] }
  0x11   :  { %s439_s25 = sld [smem:[#allocation2 + $0x2]]  ;;  %s441_s26 = sld [smem:[#allocation2 + $0x3]]  ;;  %v444_v5 = vadd.f32 %v33_v3, %v417_v0  ;;  %v37_v6 = vld [vmem:[%s769_s0] sm:$0x1]  ;;  %v43_v8 = vld [vmem:[%s769_s0 + $0x1] sm:$0x1]  ;;  %v457_v10 = vadd.f32 %v35_v4, %v422_v1 }
  0x12   :  { %v38_v7 = vmax.f32 %v37_v6, 0.0  ;;  %v49_v9 = vld [vmem:[%s769_s0 + $0x2] sm:$0x1]  ;;  %vm61_vm0 = vcmp.eq.f32.partialorder %v427_v2, 1.0  ;;  %v44_v11 = vmax.f32 %v43_v8, 0.0  ;;  %s465_s7 = sld [smem:[#allocation2 + $0x4]] }
  0x13   :  { %v50_v12 = vmax.f32 %v49_v9, 0.0  ;;  %v55_v13 = vld [vmem:[%s769_s0 + $0x3] sm:$0x1]  ;;  %v392_v16 = vmov 3.9933112   ;;  %s471_s8 = sld [smem:[#allocation2 + $0x5]] }
  0x14   :  { %v39_v14 = vsub.f32 %v444_v5, %v38_v7  ;;  %v56_v15 = vmax.f32 %v55_v13, 0.0  ;;  %v62_v17 = vsel %vm61_vm0, 0.295, %v392_v16  ;;  %v45_v18 = vsub.f32 %v457_v10, %v44_v11  ;;  %v93_v38 = vld [vmem:[%s769_s0 + $0x16] sm:$0x1] }
  0x15   :  { %v51_v19 = vadd.f32 %v50_v12, %v444_v5  ;;  %v393_v20 = vmov 1.5437086   ;;  %v394_v24 = vmov 1.641755   ;;  %vm65_vm1 = vcmp.eq.f32.partialorder %v427_v2, 2.0 }
  0x16   :  { %v63_v21 = vsel %vm61_vm0, 1.6, %v393_v20  ;;  %v40_v22 = vmul.f32 4.0, %v39_v14  ;;  %v57_v23 = vadd.f32 %v56_v15, %v457_v10  ;;  %v64_v25 = vsel %vm61_vm0, 0.3175, %v394_v24 }
  0x17   :  { %v46_v26 = vmul.f32 4.0, %v45_v18  ;;  %v52_v27 = vmul.f32 4.0, %v51_v19  ;;  %v66_v28 = vsel %vm65_vm1, 1.3464516, %v62_v17  ;;  %v67_v29 = vsel %vm65_vm1, 1.5532258, %v63_v21 }
  0x18   :  { %v41_v30 = vmax.f32 %v40_v22, 0.0  ;;  %v58_v31 = vmul.f32 4.0, %v57_v23  ;;  %v68_v32 = vsel %vm65_vm1, 0.3883871, %v64_v25  ;;  %vm69_vm2 = vcmp.eq.f32.partialorder %v427_v2, 3.0 }
  0x19   :  { %v47_v33 = vmax.f32 %v46_v26, 0.0  ;;  %v70_v34 = vsel %vm69_vm2, 2.503, %v66_v28  ;;  %v71_v35 = vsel %vm69_vm2, 1.72, %v67_v29  ;;  %v53_v36 = vmax.f32 %v52_v27, 0.0 }
  0x1a   :  { %v72_v37 = vsel %vm69_vm2, 1.077, %v68_v32  ;;  %vm73_vm3 = vcmp.eq.f32.partialorder %v427_v2, 4.0  ;;  %v97_v39 = vld [vmem:[%s769_s0 + $0x17] sm:$0x1]  ;;  %v485_v40 = vmin.f32 %v41_v30, 512.0  ;;  %v116_v57 = vstv %s432_s21 }
  0x1b   :  { %v59_v41 = vmax.f32 %v58_v31, 0.0  ;;  %v74_v42 = vsel %vm73_vm3, 9.1775, %v70_v34  ;;  %v75_v43 = vsel %vm73_vm3, 2.95, %v71_v35  ;;  %v487_v44 = vmin.f32 %v47_v33, 64.0 }
  0x1c   :  { %v76_v45 = vsel %vm73_vm3, 2.3425, %v72_v37  ;;  %vm77_vm4 = vcmp.eq.f32.partialorder %v427_v2, 5.0  ;;  %vm81_vm5 = vcmp.eq.f32.partialorder %v427_v2, 6.0  ;;  %vm85_vm6 = vcmp.eq.f32.partialorder %v427_v2, 7.0 }
  0x1d   :  { %v78_v46 = vsel %vm77_vm4, 10.36551, %v74_v42  ;;  %v79_v47 = vsel %vm77_vm4, 3.3163266, %v75_v43  ;;  %v80_v48 = vsel %vm77_vm4, 2.4546938, %v76_v45  ;;  %v113_v9 = vstv %s439_s25 }
  0x1e   :  { %v82_v49 = vsel %vm81_vm5, 6.016911, %v78_v46  ;;  %v83_v50 = vsel %vm81_vm5, 3.4120016, %v79_v47  ;;  %v84_v51 = vsel %vm81_vm5, 2.2783184, %v80_v48  ;;  %v121_v17 = vstv %s441_s26 }
  0x1f   :  { %vm89_vm7 = vcmp.eq.f32.partialorder %v427_v2, 8.0  ;;  %v94_v52 = vmul.f32 1.442695, %v93_v38  ;;  %v98_v53 = vmul.f32 1.442695, %v97_v39  ;;  %v493_v54 = vmin.f32 %v53_v36, 512.0 }
  0x20   :  { %v86_v55 = vsel %vm85_vm6, 4.824963, %v82_v49  ;;  %v87_v56 = vsel %vm85_vm6, 2.046904, %v83_v50  ;;  %v88_v58 = vsel %vm85_vm6, 1.78939, %v84_v51  ;;  %v124_v18 = vstv %s434_s22 }
  0x21   :  { %v90_v59 = vsel %vm89_vm7, 8.804088, %v86_v55  ;;  %v500_v60 = vsel %vm89_vm7, 2.916193, %v87_v56  ;;  %365 = vpow2.f32 %v94_v52  ;;  %v502_v61 = vmin.f32 %v59_v41, 64.0 }
  0x22   :  { %367 = vpow2.f32 %v98_v53  ;;  %v101_v62 = vld [vmem:[%s769_s0 + $0x18] sm:$0x1]  ;;  %v105_v63 = vld [vmem:[%s769_s0 + $0x29] sm:$0x1]  ;;  %v111_v3 = vmul.f32 4.0, %v444_v5  ;;  %v112_v7 = vmul.f32 4.0, %v457_v10  ;;  %v119_v24 = vstv %s465_s7 }
  0x23   :  { %v102_v4 = vmul.f32 1.442695, %v101_v62  ;;  %v106_v6 = vsub.f32 0.0, %v105_v63  ;;  %v131_v8 = vld [vmem:[%s769_s0 + $0x1a] sm:$0x1]  ;;  %369 = vrcp.f32 %v116_v57  ;;  %v395_v25 = vmov 0.0  }
  0x24   :  { %v132_v11 = vld [vmem:[%s769_s0 + $0x19] sm:$0x1]  ;;  %v134_v5 = vld [vmem:[%s769_s0 + $0x1c] sm:$0x1]  ;;  %v135_v12 = vld [vmem:[%s769_s0 + $0x1b] sm:$0x1]  ;;  %v544_v29 = vsub.f32 %v111_v3, %v113_v9  ;;  %v546_v30 = vsub.f32 %v112_v7, %v121_v17  ;;  %v127_v34 = vstv %s471_s8 }
  0x25   :  { %371 = vpow2.f32 %v102_v4  ;;  %v107_v10 = vmul.f32 1.442695, %v106_v6  ;;  %v133_v13 = vsub.f32 %v131_v8, %v132_v11  ;;  %v136_v14 = vsub.f32 %v134_v5, %v135_v12  ;;  %v140_v15 = vld [vmem:[%s769_s0 + $0x1e] sm:$0x1]  ;;  %v141_v16 = vld [vmem:[%s769_s0 + $0x1d] sm:$0x1] }
  0x26   :  { %v142_v19 = vsub.f32 %v140_v15, %v141_v16  ;;  %v146_v20 = vld [vmem:[%s769_s0 + $0x20] sm:$0x1]  ;;  %v147_v21 = vld [vmem:[%s769_s0 + $0x1f] sm:$0x1]  ;;  %v92_v22 = vsel %vm89_vm7, 2.0764925, %v88_v58 }
  0x27   :  { %373 = vpow2.f32 %v107_v10  ;;  %vm137_vm8 = vcmp.gt.f32.partialorder %v136_v14, %v133_v13  ;;  %v148_v23 = vsub.f32 %v146_v20, %v147_v21  ;;  %v232_v28 = vrot.slane %v487_v44, 7  ;;  %v151_v2 = vld [vmem:[%s769_s0 + $0x21] sm:$0x1]  ;;  %v152_v31 = vld [vmem:[%s769_s0 + $0x22] sm:$0x1] }
  0x28   :  { %v138_v26 = vsel %vm137_vm8, 1.0, %v395_v25  ;;  %v139_v27 = vsel %vm137_vm8, %v136_v14, %v133_v13  ;;  %375 = vrcp.f32 %v124_v18  ;;  %v154_v32 = vld [vmem:[%s769_s0 + $0x23] sm:$0x1]  ;;  %v156_v33 = vld [vmem:[%s769_s0 + $0x24] sm:$0x1]  ;;  %v235_v42 = vrot.slane %v493_v54, 6 }
  0x29   :  { %vm143_vm9 = vcmp.gt.f32.partialorder %v142_v19, %v139_v27  ;;  %v160_v37 = vld [vmem:[%s769_s0 + $0x25] sm:$0x1]  ;;  %v162_v38 = vld [vmem:[%s769_s0 + $0x26] sm:$0x1]  ;;  %v174_v41 = vld [vmem:[%s769_s0 + $0x7] sm:$0x1] }
  0x2a   :  { %v144_v35 = vsel %vm143_vm9, 2.0, %v138_v26  ;;  %v145_v36 = vsel %vm143_vm9, %v142_v19, %v139_v27  ;;  %v171_v39 = vld [vmem:[%s769_s0 + $0x6] sm:$0x1]  ;;  %v166_v45 = vld [vmem:[%s769_s0 + $0x27] sm:$0x1]  ;;  %v175_v47 = vadd.f32 %v174_v41, %v422_v1  ;;  %v238_v50 = vrot.slane %v502_v61, 5 }
  0x2b   :  { %v366_v43 = vpop.eup %365  ;;  %vm149_vm10 = vcmp.gt.f32.partialorder %v148_v23, %v145_v36  ;;  %v172_v46 = vadd.f32 %v171_v39, %v417_v0  ;;  %v177_v48 = vld [vmem:[%s769_s0 + $0x8] sm:$0x1]  ;;  %v180_v49 = vld [vmem:[%s769_s0 + $0x9] sm:$0x1]  ;;  %v183_v58 = vld [vmem:[%s769_s0 + $0xa] sm:$0x1] }
  0x2c   :  { %v368_v51 = vpop.eup %367  ;;  %v586_v52 = vmul.f32 %v366_v43, %v90_v59  ;;  %v150_v53 = vsel %vm149_vm10, 3.0, %v144_v35  ;;  %v168_v55 = vld [vmem:[%s769_s0 + $0x28] sm:$0x1]  ;;  %v178_v56 = vadd.f32 %v177_v48, %v417_v0  ;;  %v181_v57 = vadd.f32 %v180_v49, %v422_v1  ;;  %v186_v59 = vld [vmem:[%s769_s0 + $0xb] sm:$0x1] }
  0x2d   :  { %v597_v62 = vmul.f32 %v368_v51, %v500_v60  ;;  %vm153_vm11 = vcmp.eq.f32.partialorder %v150_v53, 1.0  ;;  %vm159_vm12 = vcmp.eq.f32.partialorder %v150_v53, 2.0  ;;  %vm165_vm13 = vcmp.eq.f32.partialorder %v150_v53, 3.0  ;;  %v189_v63 = vld [vmem:[%s769_s0 + $0xc] sm:$0x1]  ;;  %v370_v4 = vpop.eup %369 }
  0x2e   :  { %v192_v3 = vld [vmem:[%s769_s0 + $0xd] sm:$0x1]  ;;  %v155_v6 = vsel %vm153_vm11, %v154_v32, %v151_v2  ;;  %v157_v7 = vsel %vm153_vm11, %v156_v33, %v152_v31  ;;  %v158_v60 = vsel %vm153_vm11, 1.5707964, %v395_v25  ;;  %v609_v8 = vmul.f32 4.0, %v172_v46 }
  0x2f   :  { %v195_v9 = vld [vmem:[%s769_s0 + $0xe] sm:$0x1]  ;;  %v372_v11 = vpop.eup %371  ;;  %v615_v5 = vmul.f32 0.5, %v597_v62  ;;  %v161_v12 = vsel %vm159_vm12, %v160_v37, %v155_v6  ;;  %v163_v10 = vsel %vm159_vm12, %v162_v38, %v157_v7  ;;  %v164_v13 = vsel %vm159_vm12, 3.1415927, %v158_v60 }
  0x30   :  { %v196_v14 = vld [vmem:[%s769_s0 + $0xf] sm:$0x1]  ;;  %v620_v15 = vmul.f32 %v372_v11, %v92_v22  ;;  %v623_v16 = vsel %vm165_vm13, %v166_v45, %v161_v12  ;;  %v626_v17 = vsel %vm165_vm13, %v168_v55, %v163_v10  ;;  %v629_v18 = vsel %vm165_vm13, -1.5707964, %v164_v13  ;;  %v200_v19 = vld [vmem:[%s769_s0 + $0x10] sm:$0x1] }
  0x31   :  { %v201_v20 = vld [vmem:[%s769_s0 + $0x11] sm:$0x1]  ;;  %v374_v21 = vpop.eup %373  ;;  %v637_v22 = vmul.f32 4.0, %v175_v47  ;;  %v639_v23 = vmul.f32 4.0, %v178_v56  ;;  %v641_v26 = vmul.f32 4.0, %v181_v57  ;;  %v184_v27 = vadd.f32 %v183_v58, %v417_v0 }
  0x32   :  { %v205_v2 = vld [vmem:[%s769_s0 + $0x12] sm:$0x1]  ;;  %v109_v31 = vmax.f32 %v374_v21, 0.1  ;;  %v187_v32 = vadd.f32 %v186_v59, %v422_v1  ;;  %v190_v33 = vadd.f32 %v189_v63, %v417_v0  ;;  %v193_v35 = vadd.f32 %v192_v3, %v422_v1  ;;  %v206_v36 = vld [vmem:[%s769_s0 + $0x13] sm:$0x1]  ;;  %v376_v38 = vpop.eup %375 }
  0x33   :  { %v210_v37 = vld [vmem:[%s769_s0 + $0x14] sm:$0x1]  ;;  %v656_v39 = vmul.f32 4.0, %v184_v27  ;;  %vm197_vm14 = vcmp.lt.f32.partialorder %v195_v9, %v196_v14  ;;  %vm202_vm15 = vcmp.lt.f32.partialorder %v200_v19, %v201_v20  ;;  %vm207_vm0 = vcmp.lt.f32.partialorder %v205_v2, %v206_v36  ;;  %v211_v41 = vld [vmem:[%s769_s0 + $0x15] sm:$0x1] }
  0x34   :  { %v215_v43 = vld [vmem:[%s769_s0 + $0x2a] sm:$0x1]  ;;  %v110_v45 = vmin.f32 %v109_v31, 200.0  ;;  %v664_v46 = vmul.f32 4.0, %v187_v32  ;;  %v666_v47 = vmul.f32 4.0, %v190_v33  ;;  %v668_v48 = vmul.f32 4.0, %v193_v35 }
  0x35   :  { %v216_v49 = vld [vmem:[%s769_s0 + $0x2b] sm:$0x1]  ;;  %v674_v51 = vsel %vm197_vm14, 1.0, %v395_v25  ;;  %v677_v53 = vsel %vm202_vm15, 1.0, %v395_v25  ;;  %v680_v55 = vsel %vm207_vm0, 1.0, %v395_v25  ;;  %vm212_vm1 = vcmp.lt.f32.partialorder %v210_v37, %v211_v41 }
  0x36   :  { %v220_v56 = vld [vmem:[%s769_s0 + $0x2c] sm:$0x1]  ;;  %v115_v57 = vmul.f32 %v544_v29, %v110_v45  ;;  %v123_v58 = vmul.f32 %v546_v30, %v110_v45  ;;  %v688_v59 = vsel %vm212_vm1, 1.0, %v395_v25  ;;  %vm217_vm2 = vcmp.gt.f32.partialorder %v216_v49, %v215_v43  ;;  %v224_v6 = vld [vmem:[%s769_s0 + $0x2d] sm:$0x1] }
  0x37   :  { %v218_v63 = vsel %vm217_vm2, 1.0, %v395_v25  ;;  %v219_v3 = vsel %vm217_vm2, %v216_v49, %v215_v43  ;;  %v241_v7 = vrot.slane %v597_v62, 4  ;;  %v244_v60 = vrot.slane %v620_v15, 3  ;;  %v228_v25 = vld [vmem:[%s769_s0 + $0x2e] sm:$0x1] }
  0x38   :  { %v118_v29 = vmul.f32 %v370_v4, %v115_v57  ;;  %v126_v9 = vmul.f32 %v376_v38, %v123_v58  ;;  %vm221_vm3 = vcmp.gt.f32.partialorder %v220_v56, %v219_v3  ;;  %v247_v30 = vrot.slane %v586_v52, 2 }
  0x39   :  { %v222_v11 = vsel %vm221_vm3, 2.0, %v218_v63  ;;  %v223_v12 = vsel %vm221_vm3, %v220_v56, %v219_v3  ;;  %v250_v10 = vrot.slane %v110_v45, 1  ;;  %vm252_vm4 = vcmask 1040384  }
  0x3a   :  { %v120_v13 = vadd.f32 %v119_v24, %v118_v29  ;;  %v128_v14 = vadd.f32 %v127_v34, %v126_v9  ;;  %vm225_vm5 = vcmp.gt.f32.partialorder %v224_v6, %v223_v12  ;;  %v253_v62 = vsel %vm252_vm4, %v485_v40, %v232_v28 }
  0x3b   :  { %v226_v4 = vsel %vm225_vm5, 3.0, %v222_v11  ;;  %v227_v52 = vsel %vm225_vm5, %v224_v6, %v223_v12  ;;  %vm254_vm6 = vcmask 1041408   ;;  %vm256_vm7 = vcmask 1042432  }
  0x3c   :  { %v130_v15 = vadd.f32 %v615_v5, %v128_v14  ;;  %vm229_vm8 = vcmp.gt.f32.partialorder %v228_v25, %v227_v52  ;;  %v255_v19 = vsel %vm254_vm6, %v253_v62, %v235_v42  ;;  %vm258_vm9 = vcmask 1043456  }
  0x3d   :  { %v230_v24 = vsel %vm229_vm8, 4.0, %v226_v4  ;;  %v257_v44 = vsel %vm256_vm7, %v255_v19, %v238_v50  ;;  %vm260_vm10 = vcmask 1044480   ;;  %vm262_vm11 = vcmask 1045504  }
  0x3e   :  { %v259_v40 = vsel %vm258_vm9, %v257_v44, %v241_v7  ;;  %vm264_vm12 = vcmask 1046528   ;;  %v268_v28 = vrot.slane %v130_v15, 7  ;;  %v270_v34 = vrot.slane %v110_v45, 6 }
  0x3f   :  { %v261_v5 = vsel %vm260_vm10, %v259_v40, %v244_v60  ;;  %v273_v20 = vrot.slane %v623_v16, 5  ;;  %v276_v54 = vrot.slane %v626_v17, 4  ;;  %v279_v42 = vrot.slane %v629_v18, 3 }
  0x40   :  { %v263_v21 = vsel %vm262_vm11, %v261_v5, %v247_v30  ;;  %v282_v61 = vrot.slane %v609_v8, 2  ;;  %v285_v50 = vrot.slane %v637_v22, 1  ;;  %v287_v27 = vsel %vm252_vm4, %v120_v13, %v268_v28 }
  0x41   :  { %v265_v2 = vsel %vm264_vm12, %v263_v21, %v250_v10  ;;  %v288_v31 = vsel %vm254_vm6, %v287_v27, %v270_v34  ;;  %v296_v32 = vrot.slane %v641_v26, 7  ;;  %v299_v16 = vrot.slane %v656_v39, 6 }
  0x42   :  { %266 = vst [vmem:[%s771_s2] sm:$0xff] %v265_v2  ;;  %v289_v17 = vsel %vm256_vm7, %v288_v31, %v273_v20  ;;  %v302_v8 = vrot.slane %v664_v46, 5  ;;  %v305_v18 = vrot.slane %v666_v47, 4  ;;  %v308_v22 = vrot.slane %v668_v48, 3 }
  0x43   :  { %v290_v33 = vsel %vm258_vm9, %v289_v17, %v276_v54  ;;  %v311_v35 = vrot.slane %v674_v51, 2  ;;  %v314_v26 = vrot.slane %v677_v53, 1  ;;  %v316_v36 = vsel %vm252_vm4, %v639_v23, %v296_v32 }
  0x44   :  { %v291_v37 = vsel %vm260_vm10, %v290_v33, %v279_v42  ;;  %v317_v38 = vsel %vm254_vm6, %v316_v36, %v299_v16  ;;  %v324_v39 = vmul.f32 4.0, %v417_v0  ;;  %v325_v41 = vmul.f32 4.0, %v422_v1 }
  0x45   :  { %v292_v43 = vsel %vm262_vm11, %v291_v37, %v282_v61  ;;  %v318_v45 = vsel %vm256_vm7, %v317_v38, %v302_v8  ;;  %v327_v46 = vrot.slane %v688_v59, 7  ;;  %v330_v47 = vrot.slane %v230_v24, 6 }
  0x46   :  { %v293_v48 = vsel %vm264_vm12, %v292_v43, %v285_v50  ;;  %v319_v49 = vsel %vm258_vm9, %v318_v45, %v305_v18  ;;  %v333_v23 = vrot.slane %v324_v39, 5  ;;  %v336_v51 = vrot.slane %v325_v41, 4 }
  0x47   :  { %294 = vst [vmem:[%s771_s2 + $0x8] sm:$0xff] %v293_v48  ;;  %v320_v0 = vsel %vm260_vm10, %v319_v49, %v308_v22  ;;  %v338_v1 = vsel %vm252_vm4, %v680_v55, %v327_v46 }
  0x48   :  { %v321_v53 = vsel %vm262_vm11, %v320_v0, %v311_v35  ;;  %v339_v56 = vsel %vm254_vm6, %v338_v1, %v330_v47 }
  0x49   :  { %v322_v57 = vsel %vm264_vm12, %v321_v53, %v314_v26  ;;  %v340_v58 = vsel %vm256_vm7, %v339_v56, %v333_v23 }
  0x4a   :  { %323 = vst [vmem:[%s771_s2 + $0x10] sm:$0xff] %v322_v57  ;;  %v341_v59 = vsel %vm258_vm9, %v340_v58, %v336_v51 }
  0x4b   :  { %v342_v63 = vsel %vm260_vm10, %v341_v59, 0.0 }
  0x4c   :  { %v343_v3 = vsel %vm262_vm11, %v342_v63, 0.0 }
  0x4d   :  { %v344_v55 = vsel %vm264_vm12, %v343_v3, 0.0 }
  0x4e   :  { %345 = vst [vmem:[%s771_s2 + $0x18] sm:$0xff] %v344_v55 }
  0x4f   :  { %350 = vsyncpa [#allocation3], 1 }

</bundles_post_ra>
